<compile_context>
chip_gen: v5e
topology: v5e:2x2
jax: 0.10.0
libtpu: 0.0.40
codegen_flags: <defaults>
</compile_context>

<pallas_src>
import functools
import math

import jax
import jax.numpy as jnp
from jax import lax
from jax.experimental import pallas as pl
from jax.experimental.pallas import tpu as pltpu

EPS = 1e-5  # BatchNorm1d default eps


# ---------------------------------------------------------------------------
# small static helpers
# ---------------------------------------------------------------------------
def _round_up(v, m):
    return ((v + m - 1) // m) * m


def _padded_size(n):
    # Small graphs: 8-row alignment (single row tile). Large graphs: 128 so the
    # streaming row tiles and the lane-dense score blocks are (8,128)-aligned.
    n = max(int(n), 1)
    return _round_up(n, 8) if n <= 256 else _round_up(n, 128)


def _vmem_capacity_bytes():
    try:
        info = pltpu.get_tpu_info()
        for attr in ("vmem_capacity_bytes", "vmem_bytes", "vmem_size_bytes"):
            v = getattr(info, attr, None)
            if v:
                return int(v)
    except Exception:
        pass
    return 64 << 20  # conservative default (v7x)


def _pick_tile(n_pad, vmem_bytes):
    """Row tile for streaming / chunking A.  n_pad is a multiple of 8 (128 if >256)."""
    if n_pad <= 256:
        return n_pad                      # single row tile; everything resident
    per_buf = (4 << 20) if vmem_bytes <= (64 << 20) else (12 << 20)
    max_rows = min(1024, max(128, per_buf // (2 * n_pad)))
    max_rows = max(128, (max_rows // 128) * 128)
    t = max_rows
    while t > 128:
        if n_pad % t == 0:
            return t
        t -= 128
    return 128


def _compiler_params(n_pad, f_aug, hdim, tile, resident, vmem_bytes):
    """VMEM estimate including (8,128) padding + double buffering."""
    def padded(r, c, itemsize):
        return _round_up(max(r, 1), 8) * _round_up(max(c, 1), 128) * itemsize

    a_rows = n_pad if resident else tile
    est = (2 * padded(a_rows, n_pad, 2)        # A blocks (bf16, double buffered)
           + 2 * padded(n_pad, f_aug, 2)       # resident X (+ validity column)
           + 2 * padded(n_pad, hdim, 2)        # resident bf16 h output
           + 2 * padded(1, tile, 4)            # lane-dense score blocks
           + 2 * (2 * padded(f_aug, hdim, 2) + padded(2, hdim, 2))  # weights
           + 2 * (2 * padded(1, hdim, 4))      # gamma / beta
           + 2 * padded(1, hdim, 4)            # BN stats scratch
           + padded(1, n_pad, 2))              # z0 scratch
    cap = (3 * vmem_bytes) // 4                # ~48 MiB on 64-MiB parts, ~96 MiB on 128-MiB
    limit = int(min(cap, max(32 << 20, 2 * est)))
    return pltpu.CompilerParams(
        dimension_semantics=("arbitrary", "arbitrary"),
        vmem_limit_bytes=limit)


# ---------------------------------------------------------------------------
# Fused per-layer kernel (grid = (phase, row-tile)):
#   phase 0, per row tile of A:
#       prod = A_tile @ [X | valid]          (agg + degree in one MXU pass)
#       agg  = prod[:, :F] / max(deg, 1)     (mean aggregation, f32)
#       h    = agg @ W_l + [X_rows|valid] @ [W_r; b_l]      (bias folded in)
#       store bf16 h; accumulate sum(h), sum(h^2) (padded rows are exactly 0)
#   phase 0, last tile:
#       chunked BN + ReLU (fori_loop, f32 math, bf16 store)
#       z0 = w_rel^T @ xa^T                  (lane-dense (1,N), one NT matmul)
#   phase 1, per row tile of A:
#       s = tanh(z0 @ A_tile^T + w_root^T @ xa_rows^T + b_rel)   (all bf16 MXU)
# ---------------------------------------------------------------------------
def _fused_layer_kernel(a_ref, x_ref, wl_ref, wr_ref, g_ref, be_ref,
                        wsc_ref, bsc_ref,                 # inputs
                        h_ref, s_ref,                     # outputs
                        sum_ref, ssq_ref, z0_ref,         # scratch
                        *, n_valid, tile, resident):
    phase = pl.program_id(0)
    i = pl.program_id(1)
    n_pad, hdim = h_ref.shape
    nt = n_pad // tile
    fdim = x_ref.shape[1] - 1                 # true feature count (last col = validity)
    NT = (((1,), (1,)), ((), ()))             # contract last dims of both operands

    row0 = pl.multiple_of(i * tile, 8)

    def a_rows():
        if resident:
            return a_ref[pl.ds(row0, tile), :]
        return a_ref[...]

    # -- phase 0, first tile: zero the BN-stat accumulators ------------------
    @pl.when((phase == 0) & (i == 0))
    def _init():
        sum_ref[...] = jnp.zeros_like(sum_ref)
        ssq_ref[...] = jnp.zeros_like(ssq_ref)

    # -- phase 0: SAGEConv on one row tile + BN partial stats ----------------
    @pl.when(phase == 0)
    def _conv():
        a = a_rows()                                          # (T, N) bf16 counts
        # A @ [X | valid] gives the neighbour aggregate AND the degree at once.
        prod = jnp.dot(a, x_ref[...], preferred_element_type=jnp.float32)  # (T, F+1)
        deg = prod[:, fdim:fdim + 1]
        inv_deg = 1.0 / jnp.maximum(deg, 1.0)
        agg = (prod[:, :fdim] * inv_deg).astype(jnp.bfloat16)
        x_rows = x_ref[pl.ds(row0, tile), :]                  # (T, F+1); validity col pairs with bias row
        # TODO(synk): concatenating [agg | x_rows] into a single (T, 2F+1) @
        # (2F+1, H) matmul would halve MXU pushes; kept as two matmuls to avoid
        # an unaligned lane concat.
        h = (jnp.dot(agg, wl_ref[...], preferred_element_type=jnp.float32)
             + jnp.dot(x_rows, wr_ref[...], preferred_element_type=jnp.float32))
        h_ref[pl.ds(row0, tile), :] = h.astype(h_ref.dtype)
        # Padded rows are exactly zero (zero A row + zero validity), so the
        # unmasked accumulation already equals the stats over valid rows.
        sum_ref[...] += jnp.sum(h, axis=0, keepdims=True)
        ssq_ref[...] += jnp.sum(h * h, axis=0, keepdims=True)

    # -- phase 0, last tile: chunked BN + ReLU, then lane-dense z0 -----------
    @pl.when((phase == 0) & (i == nt - 1))
    def _bn_relu_proj():
        inv_n = 1.0 / float(n_valid)
        mean = sum_ref[...] * inv_n
        var = jnp.maximum(ssq_ref[...] * inv_n - mean * mean, 0.0)  # clamp >= 0
        scale = lax.rsqrt(var + EPS) * g_ref[...]
        shift = be_ref[...] - mean * scale

        def body(c, carry):
            r0 = pl.multiple_of(c * tile, 8)
            hc = h_ref[pl.ds(r0, tile), :].astype(jnp.float32)
            xa = jnp.maximum(hc * scale + shift, 0.0)          # BN + ReLU (f32)
            h_ref[pl.ds(r0, tile), :] = xa.astype(h_ref.dtype)
            return carry

        lax.fori_loop(0, nt, body, 0)

        # z0[j] = w_rel . xa_j  for all nodes, as one NT matmul producing a
        # lane-dense (1, N) row (MXU streams operands from VMEM).
        z0 = lax.dot_general(wsc_ref[0:1, :], h_ref[...],
                             dimension_numbers=NT,
                             preferred_element_type=jnp.float32)
        z0_ref[...] = z0.astype(z0_ref.dtype)

    # -- phase 1: SAGPooling score, lane-dense per tile -----------------------
    @pl.when(phase == 1)
    def _score():
        a = a_rows()                                          # (T, N) bf16
        h_rows = h_ref[pl.ds(row0, tile), :]                  # (T, H) bf16, post BN+ReLU
        neigh = lax.dot_general(z0_ref[...], a,
                                dimension_numbers=NT,
                                preferred_element_type=jnp.float32)   # (1, T)
        root = lax.dot_general(wsc_ref[1:2, :], h_rows,
                               dimension_numbers=NT,
                               preferred_element_type=jnp.float32)    # (1, T)
        s_ref[...] = jnp.tanh(neigh + root + bsc_ref[0, 0])


def fused_sage_layer(a, x_aug, wl, wr_aug, gamma, beta, wsc_t, bsc, *, n_valid):
    """One fused pallas_call: SAGEConv + BN + ReLU + SAGPooling score."""
    n_pad, f_aug = x_aug.shape
    hdim = wl.shape[1]
    vmem = _vmem_capacity_bytes()
    tile = _pick_tile(n_pad, vmem)
    nt = n_pad // tile
    resident = (n_pad * n_pad * 2) <= ((16 << 20) if vmem <= (64 << 20)
                                       else (48 << 20))

    if resident:
        # constant-index full block: A is DMA'd from HBM exactly once.
        a_spec = pl.BlockSpec((n_pad, n_pad), lambda p, i: (0, 0))
    else:
        a_spec = pl.BlockSpec((tile, n_pad), lambda p, i: (i, 0))

    def full(shape):
        return pl.BlockSpec(shape, lambda p, i: (0, 0))

    kernel = functools.partial(_fused_layer_kernel,
                               n_valid=n_valid, tile=tile, resident=resident)

    h_out, score = pl.pallas_call(
        kernel,
        out_shape=(jax.ShapeDtypeStruct((n_pad, hdim), jnp.bfloat16),
                   jax.ShapeDtypeStruct((1, n_pad), jnp.float32)),
        grid_spec=pltpu.PrefetchScalarGridSpec(
            num_scalar_prefetch=0,
            grid=(2, nt),                                 # (phase, row-tile)
            in_specs=[a_spec,
                      full((n_pad, f_aug)),
                      full(wl.shape), full(wr_aug.shape),
                      full((1, hdim)), full((1, hdim)),
                      full((2, hdim)),
                      pl.BlockSpec(memory_space=pltpu.MemorySpace.SMEM)],
            out_specs=[full((n_pad, hdim)),
                       # phase 0 parks on block 0 (no write-back until phase 1
                       # has filled it); phase 1 writes block i -> each (1,tile)
                       # score block is written back exactly once, lane-dense.
                       pl.BlockSpec((1, tile), lambda p, i: (0, i * p))],
            scratch_shapes=[pltpu.VMEM((1, hdim), jnp.float32),    # sum(h)
                            pltpu.VMEM((1, hdim), jnp.float32),    # sum(h^2)
                            pltpu.VMEM((1, n_pad), jnp.bfloat16)]),  # z0 (lane-dense)
        compiler_params=_compiler_params(n_pad, f_aug, hdim, tile, resident, vmem),
    )(a, x_aug, wl, wr_aug, gamma, beta, wsc_t, bsc)
    return h_out, score[0]


# ---------------------------------------------------------------------------
# Plain-JAX glue
# ---------------------------------------------------------------------------
def dense_adj_counts(edge_index, n_pad):
    """Dense destination-major edge-count matrix A[i, j] = #edges j -> i (bf16)."""
    src, dst = edge_index[0], edge_index[1]
    a = jnp.zeros((n_pad, n_pad), jnp.float32).at[dst, src].add(1.0)
    return a.astype(jnp.bfloat16)


def _augment(x_bf16, n_valid, n_pad):
    """Pad rows to n_pad and append the validity/ones column (folds degree + bias)."""
    n, _ = x_bf16.shape
    if n < n_pad:
        x_bf16 = jnp.pad(x_bf16, ((0, n_pad - n), (0, 0)))
    valid = (jnp.arange(n_pad) < n_valid).astype(jnp.bfloat16)[:, None]
    return jnp.concatenate([x_bf16, valid], axis=1)


def topk_pool(h, score, a, n_valid, ratio=0.5):
    """SAGPooling: top-k node selection + induced sub-adjacency (JAX glue).

    Padded rows are masked to -inf before the top-k; the pooled graph is padded
    back up to a multiple of 8 (128 for large graphs) with exactly-zero rows.
    NOTE: argsort tie-breaking can differ from torch.topk for tied scores.
    """
    n_pad = h.shape[0]
    k = int(math.ceil(ratio * n_valid))
    k_pad = _padded_size(k)

    valid = jnp.arange(n_pad) < n_valid
    masked = jnp.where(valid, score, -jnp.inf)
    perm = jnp.argsort(-masked)[:k_pad]
    gate = jnp.arange(k_pad) < k

    w = jnp.where(gate, score[perm], 0.0)
    x_new = (h[perm].astype(jnp.float32) * w[:, None]).astype(jnp.bfloat16)

    # single fused two-axis gather of the induced sub-adjacency
    sub = a[perm[:, None], perm[None, :]]
    a_new = jnp.where(gate[:, None] & gate[None, :], sub, jnp.zeros_like(sub))
    # TODO(synk): move the row gather into the next layer's pallas_call via
    # scalar-prefetched perm indices (pl.Element row index_map) to avoid this
    # O(k^2) HBM materialization entirely.
    return x_new, a_new, k, k_pad


def net_forward(params, x, edge_index):
    n_valid = x.shape[0]
    n_pad = _padded_size(n_valid)

    a1 = dense_adj_counts(edge_index, n_pad)          # single (N, N) bf16 count matrix
    x1 = _augment(x.astype(jnp.bfloat16), n_valid, n_pad)

    # layer 1: fused SAGEConv + BN + ReLU + SAGPooling score
    h1, s1 = fused_sage_layer(
        a1, x1, params["w1_l"], params["w1_r"], params["g1"], params["be1"],
        params["wsc1"], params["bsc1"], n_valid=n_valid)
    x1p, a2, k1, k1_pad = topk_pool(h1, s1, a1, n_valid, ratio=0.5)

    # layer 2 on the pooled graph
    x2 = _augment(x1p, k1, k1_pad)
    h2, s2 = fused_sage_layer(
        a2, x2, params["w2_l"], params["w2_r"], params["g2"], params["be2"],
        params["wsc2"], params["bsc2"], n_valid=k1)
    x2p, _, k2, _ = topk_pool(h2, s2, a2, k1, ratio=0.5)

    # readout head: global_mean_pool -> ReLU -> Linear -> softmax (tiny; plain jnp).
    # Padded rows of x2p are exactly zero, so sum/k2 is the mean over real nodes;
    # the accumulation runs in f32 even though x2p is bf16.
    m = jnp.sum(x2p.astype(jnp.float32), axis=0, keepdims=True) / float(k2)
    m = jnp.maximum(m, 0.0)
    logits = jnp.dot(m, params["w_lin"]) + params["b_lin"]
    return jax.nn.softmax(logits, axis=1)


def init_params(key, in_feats):
    hs1, hs2, num_classes = in_feats * 2, in_feats * 4, 2
    ks = jax.random.split(key, 9)

    def lin(k, fi, fo):
        return jax.random.normal(k, (fi, fo), jnp.float32) / jnp.sqrt(float(fi))

    def conv(k_l, k_r, fi, fo):
        wl = lin(k_l, fi, fo).astype(jnp.bfloat16)            # lin_l (aggregated), bias below
        bl = jnp.zeros((1, fo), jnp.float32)                  # SAGEConv bias (on lin_l)
        # root weight augmented with the bias row: pairs with the validity column
        wr_aug = jnp.concatenate([lin(k_r, fi, fo), bl], axis=0).astype(jnp.bfloat16)
        return wl, wr_aug

    def score(k_rel, k_root, hidden):
        # rows: [w_rel^T ; w_root^T] -> one (2, H) bf16 weight for the score GNN
        wsc_t = jnp.concatenate([lin(k_rel, hidden, 1).T,
                                 lin(k_root, hidden, 1).T], axis=0).astype(jnp.bfloat16)
        bsc = jnp.zeros((1, 1), jnp.float32)                  # b_rel (GraphConv bias)
        return wsc_t, bsc

    w1_l, w1_r = conv(ks[0], ks[1], in_feats, hs1)
    wsc1, bsc1 = score(ks[2], ks[3], hs1)
    w2_l, w2_r = conv(ks[4], ks[5], hs1, hs2)
    wsc2, bsc2 = score(ks[6], ks[7], hs2)

    return {
        "w1_l": w1_l, "w1_r": w1_r,
        "g1": jnp.ones((1, hs1), jnp.float32), "be1": jnp.zeros((1, hs1), jnp.float32),
        "wsc1": wsc1, "bsc1": bsc1,
        "w2_l": w2_l, "w2_r": w2_r,
        "g2": jnp.ones((1, hs2), jnp.float32), "be2": jnp.zeros((1, hs2), jnp.float32),
        "wsc2": wsc2, "bsc2": bsc2,
        "w_lin": lin(ks[8], hs2, num_classes),
        "b_lin": jnp.zeros((1, num_classes), jnp.float32),
    }


if __name__ == "__main__":
    key = jax.random.PRNGKey(0)
    k_x, k_e, k_p = jax.random.split(key, 3)

    N, IN_FEATS, E = 16, 8, 48
    x = jax.random.normal(k_x, (N, IN_FEATS), jnp.float32)      # data.x
    edge_index = jax.random.randint(k_e, (2, E), 0, N)          # data.edge_index
    # data.batch = zeros (single graph) -> global_mean_pool = mean over nodes.

    params = init_params(k_p, IN_FEATS)
    fwd = jax.jit(net_forward)
    out = jax.block_until_ready(fwd(params, x, edge_index))

    assert out.shape == (1, 2)
    assert bool(jnp.all(jnp.isfinite(out)))
    assert bool(jnp.allclose(jnp.sum(out, axis=1), 1.0, atol=1e-5))
    print("KERNEL_OK")
</pallas_src>

<mosaic_0001>
module attributes {stable_mosaic.version = 11 : i64} {
  func.func @_fused_layer_kernel(%arg0: i32, %arg1: i32, %arg2: memref<16x16xbf16, #tpu.memory_space<vmem>>, %arg3: memref<16x9xbf16, #tpu.memory_space<vmem>>, %arg4: memref<8x16xbf16, #tpu.memory_space<vmem>>, %arg5: memref<9x16xbf16, #tpu.memory_space<vmem>>, %arg6: memref<1x16xf32, #tpu.memory_space<vmem>>, %arg7: memref<1x16xf32, #tpu.memory_space<vmem>>, %arg8: memref<2x16xbf16, #tpu.memory_space<vmem>>, %arg9: memref<1x1xf32, #tpu.memory_space<smem>>, %arg10: memref<16x16xbf16, #tpu.memory_space<vmem>>, %arg11: memref<1x16xf32, #tpu.memory_space<vmem>>, %arg12: memref<1x16xf32, #tpu.memory_space<vmem>>, %arg13: memref<1x16xf32, #tpu.memory_space<vmem>>, %arg14: memref<1x16xbf16, #tpu.memory_space<vmem>>) attributes {dimension_semantics = [#tpu.dimension_semantics<arbitrary>, #tpu.dimension_semantics<arbitrary>], iteration_bounds = array<i64: 2, 1>, scalar_prefetch = 0 : i64, scratch_operands = 3 : i64, tpu.core_type = #tpu.core_type<tc>, window_params = [{pipeline_mode = #tpu.pipeline_mode<synchronous>, transform_indices = @transform_0, window_bounds = array<i64: 16, 16>}, {pipeline_mode = #tpu.pipeline_mode<synchronous>, transform_indices = @transform_1, window_bounds = array<i64: 16, 9>}, {pipeline_mode = #tpu.pipeline_mode<synchronous>, transform_indices = @transform_2, window_bounds = array<i64: 8, 16>}, {pipeline_mode = #tpu.pipeline_mode<synchronous>, transform_indices = @transform_3, window_bounds = array<i64: 9, 16>}, {pipeline_mode = #tpu.pipeline_mode<synchronous>, transform_indices = @transform_4, window_bounds = array<i64: 1, 16>}, {pipeline_mode = #tpu.pipeline_mode<synchronous>, transform_indices = @transform_5, window_bounds = array<i64: 1, 16>}, {pipeline_mode = #tpu.pipeline_mode<synchronous>, transform_indices = @transform_6, window_bounds = array<i64: 2, 16>}, {transform_indices = @transform_7, window_bounds = array<i64: 1, 1>}, {pipeline_mode = #tpu.pipeline_mode<synchronous>, transform_indices = @transform_8, window_bounds = array<i64: 16, 16>}, {transform_indices = @transform_9, window_bounds = array<i64: 1, 16>}]} {
    %c16_i32 = arith.constant 16 : i32
    %0 = arith.muli %arg1, %c16_i32 : i32
    %1 = tpu.assume_multiple %0, 8 : i32
    %c0_i32 = arith.constant 0 : i32
    %2 = arith.cmpi eq, %arg0, %c0_i32 : i32
    %c0_i32_0 = arith.constant 0 : i32
    %3 = arith.cmpi eq, %arg1, %c0_i32_0 : i32
    %4 = arith.andi %2, %3 : i1
    %5 = arith.extui %4 : i1 to i32
    %c0_i32_1 = arith.constant 0 : i32
    %6 = arith.cmpi ne, %5, %c0_i32_1 : i32
    scf.if %6 {
      %cst = arith.constant 0.000000e+00 : f32
      %18 = vector.broadcast %cst : f32 to vector<1x16xf32>
      %c0 = arith.constant 0 : index
      %c0_8 = arith.constant 0 : index
      %19 = vector.load %arg12[%c0, %c0_8] : memref<1x16xf32, #tpu.memory_space<vmem>>, vector<1x16xf32>
      tpu.vector_store %arg12[%c0, %c0_8], %18 {strides = array<i32>} : memref<1x16xf32, #tpu.memory_space<vmem>>, vector<1x16xf32>,
      %cst_9 = arith.constant 0.000000e+00 : f32
      %20 = vector.broadcast %cst_9 : f32 to vector<1x16xf32>
      %c0_10 = arith.constant 0 : index
      %c0_11 = arith.constant 0 : index
      %21 = vector.load %arg13[%c0_10, %c0_11] : memref<1x16xf32, #tpu.memory_space<vmem>>, vector<1x16xf32>
      tpu.vector_store %arg13[%c0_10, %c0_11], %20 {strides = array<i32>} : memref<1x16xf32, #tpu.memory_space<vmem>>, vector<1x16xf32>,
    } else {
    }
    %c0_i32_2 = arith.constant 0 : i32
    %7 = arith.cmpi eq, %arg0, %c0_i32_2 : i32
    %8 = arith.extui %7 : i1 to i32
    %c0_i32_3 = arith.constant 0 : i32
    %9 = arith.cmpi ne, %8, %c0_i32_3 : i32
    scf.if %9 {
      %18 = arith.index_cast %1 : i32 to index
      %c0 = arith.constant 0 : index
      %19 = vector.load %arg2[%18, %c0] : memref<16x16xbf16, #tpu.memory_space<vmem>>, vector<16x16xbf16>
      %c0_8 = arith.constant 0 : index
      %c0_9 = arith.constant 0 : index
      %20 = vector.load %arg3[%c0_8, %c0_9] : memref<16x9xbf16, #tpu.memory_space<vmem>>, vector<16x9xbf16>
      %cst = arith.constant dense<0.000000e+00> : vector<16x9xf32>
      %21 = tpu.matmul %19, %20, %cst {dimension_numbers = #tpu.dot_dimension_numbers<[1], [0], [0], [1], [0, 0, 1, 1], [], []>} : vector<16x16xbf16>, vector<16x9xbf16>, vector<16x9xf32> -> vector<16x9xf32>
      %22 = vector.extract_strided_slice %21 {offsets = [0, 8], sizes = [16, 1], strides = [1, 1]} : vector<16x9xf32> to vector<16x1xf32>
      %cst_10 = arith.constant 1.000000e+00 : f32
      %23 = vector.broadcast %cst_10 : f32 to vector<16x1xf32>
      %24 = arith.maximumf %22, %23 : vector<16x1xf32>
      %cst_11 = arith.constant 1.000000e+00 : f32
      %25 = vector.broadcast %cst_11 : f32 to vector<16x1xf32>
      %26 = arith.divf %25, %24 : vector<16x1xf32>
      %27 = vector.extract_strided_slice %21 {offsets = [0, 0], sizes = [16, 8], strides = [1, 1]} : vector<16x9xf32> to vector<16x8xf32>
      %28 = vector.broadcast %26 : vector<16x1xf32> to vector<16x8xf32>
      %29 = arith.mulf %27, %28 : vector<16x8xf32>
      %30 = arith.truncf %29 : vector<16x8xf32> to vector<16x8xbf16>
      %31 = arith.index_cast %1 : i32 to index
      %c0_12 = arith.constant 0 : index
      %32 = vector.load %arg3[%31, %c0_12] : memref<16x9xbf16, #tpu.memory_space<vmem>>, vector<16x9xbf16>
      %c0_13 = arith.constant 0 : index
      %c0_14 = arith.constant 0 : index
      %33 = vector.load %arg4[%c0_13, %c0_14] : memref<8x16xbf16, #tpu.memory_space<vmem>>, vector<8x16xbf16>
      %cst_15 = arith.constant dense<0.000000e+00> : vector<16x16xf32>
      %34 = tpu.matmul %30, %33, %cst_15 {dimension_numbers = #tpu.dot_dimension_numbers<[1], [0], [0], [1], [0, 0, 1, 1], [], []>} : vector<16x8xbf16>, vector<8x16xbf16>, vector<16x16xf32> -> vector<16x16xf32>
      %c0_16 = arith.constant 0 : index
      %c0_17 = arith.constant 0 : index
      %35 = vector.load %arg5[%c0_16, %c0_17] : memref<9x16xbf16, #tpu.memory_space<vmem>>, vector<9x16xbf16>
      %cst_18 = arith.constant dense<0.000000e+00> : vector<16x16xf32>
      %36 = tpu.matmul %32, %35, %cst_18 {dimension_numbers = #tpu.dot_dimension_numbers<[1], [0], [0], [1], [0, 0, 1, 1], [], []>} : vector<16x9xbf16>, vector<9x16xbf16>, vector<16x16xf32> -> vector<16x16xf32>
      %37 = arith.addf %34, %36 : vector<16x16xf32>
      %38 = arith.truncf %37 : vector<16x16xf32> to vector<16x16xbf16>
      %39 = arith.index_cast %1 : i32 to index
      %c0_19 = arith.constant 0 : index
      %40 = vector.load %arg10[%39, %c0_19] : memref<16x16xbf16, #tpu.memory_space<vmem>>, vector<16x16xbf16>
      tpu.vector_store %arg10[%39, %c0_19], %38 {strides = array<i32>} : memref<16x16xbf16, #tpu.memory_space<vmem>>, vector<16x16xbf16>,
      %c0_20 = arith.constant 0 : index
      %c0_21 = arith.constant 0 : index
      %41 = vector.load %arg12[%c0_20, %c0_21] : memref<1x16xf32, #tpu.memory_space<vmem>>, vector<1x16xf32>
      %cst_22 = arith.constant dense<0.000000e+00> : vector<16xf32>
      %42 = vector.multi_reduction <add>, %37, %cst_22 [0] : vector<16x16xf32> to vector<16xf32>
      %43 = vector.shape_cast %42 : vector<16xf32> to vector<1x16xf32>
      %44 = arith.addf %41, %43 : vector<1x16xf32>
      %c0_23 = arith.constant 0 : index
      %c0_24 = arith.constant 0 : index
      %45 = vector.load %arg12[%c0_23, %c0_24] : memref<1x16xf32, #tpu.memory_space<vmem>>, vector<1x16xf32>
      tpu.vector_store %arg12[%c0_23, %c0_24], %44 {strides = array<i32>} : memref<1x16xf32, #tpu.memory_space<vmem>>, vector<1x16xf32>,
      %c0_25 = arith.constant 0 : index
      %c0_26 = arith.constant 0 : index
      %46 = vector.load %arg13[%c0_25, %c0_26] : memref<1x16xf32, #tpu.memory_space<vmem>>, vector<1x16xf32>
      %47 = arith.mulf %37, %37 : vector<16x16xf32>
      %cst_27 = arith.constant dense<0.000000e+00> : vector<16xf32>
      %48 = vector.multi_reduction <add>, %47, %cst_27 [0] : vector<16x16xf32> to vector<16xf32>
      %49 = vector.shape_cast %48 : vector<16xf32> to vector<1x16xf32>
      %50 = arith.addf %46, %49 : vector<1x16xf32>
      %c0_28 = arith.constant 0 : index
      %c0_29 = arith.constant 0 : index
      %51 = vector.load %arg13[%c0_28, %c0_29] : memref<1x16xf32, #tpu.memory_space<vmem>>, vector<1x16xf32>
      tpu.vector_store %arg13[%c0_28, %c0_29], %50 {strides = array<i32>} : memref<1x16xf32, #tpu.memory_space<vmem>>, vector<1x16xf32>,
    } else {
    }
    %c0_i32_4 = arith.constant 0 : i32
    %10 = arith.cmpi eq, %arg0, %c0_i32_4 : i32
    %c0_i32_5 = arith.constant 0 : i32
    %11 = arith.cmpi eq, %arg1, %c0_i32_5 : i32
    %12 = arith.andi %10, %11 : i1
    %13 = arith.extui %12 : i1 to i32
    %c0_i32_6 = arith.constant 0 : i32
    %14 = arith.cmpi ne, %13, %c0_i32_6 : i32
    scf.if %14 {
      %c0 = arith.constant 0 : index
      %c0_8 = arith.constant 0 : index
      %18 = vector.load %arg12[%c0, %c0_8] : memref<1x16xf32, #tpu.memory_space<vmem>>, vector<1x16xf32>
      %cst = arith.constant 6.250000e-02 : f32
      %19 = vector.broadcast %cst : f32 to vector<1x16xf32>
      %20 = arith.mulf %18, %19 : vector<1x16xf32>
      %c0_9 = arith.constant 0 : index
      %c0_10 = arith.constant 0 : index
      %21 = vector.load %arg13[%c0_9, %c0_10] : memref<1x16xf32, #tpu.memory_space<vmem>>, vector<1x16xf32>
      %cst_11 = arith.constant 6.250000e-02 : f32
      %22 = vector.broadcast %cst_11 : f32 to vector<1x16xf32>
      %23 = arith.mulf %21, %22 : vector<1x16xf32>
      %24 = arith.mulf %20, %20 : vector<1x16xf32>
      %25 = arith.subf %23, %24 : vector<1x16xf32>
      %cst_12 = arith.constant 0.000000e+00 : f32
      %26 = vector.broadcast %cst_12 : f32 to vector<1x16xf32>
      %27 = arith.maximumf %25, %26 : vector<1x16xf32>
      %cst_13 = arith.constant 9.99999974E-6 : f32
      %28 = vector.broadcast %cst_13 : f32 to vector<1x16xf32>
      %29 = arith.addf %27, %28 : vector<1x16xf32>
      %30 = math.rsqrt %29 : vector<1x16xf32>
      %c0_14 = arith.constant 0 : index
      %c0_15 = arith.constant 0 : index
      %31 = vector.load %arg6[%c0_14, %c0_15] : memref<1x16xf32, #tpu.memory_space<vmem>>, vector<1x16xf32>
      %32 = arith.mulf %30, %31 : vector<1x16xf32>
      %c0_16 = arith.constant 0 : index
      %c0_17 = arith.constant 0 : index
      %33 = vector.load %arg7[%c0_16, %c0_17] : memref<1x16xf32, #tpu.memory_space<vmem>>, vector<1x16xf32>
      %34 = arith.mulf %20, %32 : vector<1x16xf32>
      %35 = arith.subf %33, %34 : vector<1x16xf32>
      %c0_i32_18 = arith.constant 0 : i32
      %c16_i32_19 = arith.constant 16 : i32
      %36 = arith.muli %c0_i32_18, %c16_i32_19 : i32
      %37 = tpu.assume_multiple %36, 8 : i32
      %38 = arith.index_cast %37 : i32 to index
      %c0_20 = arith.constant 0 : index
      %39 = vector.load %arg10[%38, %c0_20] : memref<16x16xbf16, #tpu.memory_space<vmem>>, vector<16x16xbf16>
      %40 = arith.extf %39 : vector<16x16xbf16> to vector<16x16xf32>
      %41 = vector.broadcast %32 : vector<1x16xf32> to vector<16x16xf32>
      %42 = arith.mulf %40, %41 : vector<16x16xf32>
      %43 = vector.broadcast %35 : vector<1x16xf32> to vector<16x16xf32>
      %44 = arith.addf %42, %43 : vector<16x16xf32>
      %cst_21 = arith.constant 0.000000e+00 : f32
      %45 = vector.broadcast %cst_21 : f32 to vector<16x16xf32>
      %46 = arith.maximumf %44, %45 : vector<16x16xf32>
      %47 = arith.truncf %46 : vector<16x16xf32> to vector<16x16xbf16>
      %48 = arith.index_cast %37 : i32 to index
      %c0_22 = arith.constant 0 : index
      %49 = vector.load %arg10[%48, %c0_22] : memref<16x16xbf16, #tpu.memory_space<vmem>>, vector<16x16xbf16>
      tpu.vector_store %arg10[%48, %c0_22], %47 {strides = array<i32>} : memref<16x16xbf16, #tpu.memory_space<vmem>>, vector<16x16xbf16>,
      %c1_i32_23 = arith.constant 1 : i32
      %c0_24 = arith.constant 0 : index
      %c0_25 = arith.constant 0 : index
      %50 = vector.load %arg8[%c0_24, %c0_25] : memref<2x16xbf16, #tpu.memory_space<vmem>>, vector<1x16xbf16>
      %c0_26 = arith.constant 0 : index
      %c0_27 = arith.constant 0 : index
      %51 = vector.load %arg10[%c0_26, %c0_27] : memref<16x16xbf16, #tpu.memory_space<vmem>>, vector<16x16xbf16>
      %cst_28 = arith.constant dense<0.000000e+00> : vector<1x16xf32>
      %52 = tpu.matmul %50, %51, %cst_28 {dimension_numbers = #tpu.dot_dimension_numbers<[1], [1], [0], [0], [0, 0, 1, 0], [], []>} : vector<1x16xbf16>, vector<16x16xbf16>, vector<1x16xf32> -> vector<1x16xf32>
      %53 = arith.truncf %52 : vector<1x16xf32> to vector<1x16xbf16>
      %c0_29 = arith.constant 0 : index
      %c0_30 = arith.constant 0 : index
      %54 = vector.load %arg14[%c0_29, %c0_30] : memref<1x16xbf16, #tpu.memory_space<vmem>>, vector<1x16xbf16>
      tpu.vector_store %arg14[%c0_29, %c0_30], %53 {strides = array<i32>} : memref<1x16xbf16, #tpu.memory_space<vmem>>, vector<1x16xbf16>,
    } else {
    }
    %c1_i32 = arith.constant 1 : i32
    %15 = arith.cmpi eq, %arg0, %c1_i32 : i32
    %16 = arith.extui %15 : i1 to i32
    %c0_i32_7 = arith.constant 0 : i32
    %17 = arith.cmpi ne, %16, %c0_i32_7 : i32
    scf.if %17 {
      %18 = arith.index_cast %1 : i32 to index
      %c0 = arith.constant 0 : index
      %19 = vector.load %arg2[%18, %c0] : memref<16x16xbf16, #tpu.memory_space<vmem>>, vector<16x16xbf16>
      %20 = arith.index_cast %1 : i32 to index
      %c0_8 = arith.constant 0 : index
      %21 = vector.load %arg10[%20, %c0_8] : memref<16x16xbf16, #tpu.memory_space<vmem>>, vector<16x16xbf16>
      %c0_9 = arith.constant 0 : index
      %c0_10 = arith.constant 0 : index
      %22 = vector.load %arg14[%c0_9, %c0_10] : memref<1x16xbf16, #tpu.memory_space<vmem>>, vector<1x16xbf16>
      %cst = arith.constant dense<0.000000e+00> : vector<1x16xf32>
      %23 = tpu.matmul %22, %19, %cst {dimension_numbers = #tpu.dot_dimension_numbers<[1], [1], [0], [0], [0, 0, 1, 0], [], []>} : vector<1x16xbf16>, vector<16x16xbf16>, vector<1x16xf32> -> vector<1x16xf32>
      %c1 = arith.constant 1 : index
      %c0_11 = arith.constant 0 : index
      %24 = vector.load %arg8[%c1, %c0_11] : memref<2x16xbf16, #tpu.memory_space<vmem>>, vector<1x16xbf16>
      %cst_12 = arith.constant dense<0.000000e+00> : vector<1x16xf32>
      %25 = tpu.matmul %24, %21, %cst_12 {dimension_numbers = #tpu.dot_dimension_numbers<[1], [1], [0], [0], [0, 0, 1, 0], [], []>} : vector<1x16xbf16>, vector<16x16xbf16>, vector<1x16xf32> -> vector<1x16xf32>
      %26 = arith.addf %23, %25 : vector<1x16xf32>
      %c0_13 = arith.constant 0 : index
      %c0_14 = arith.constant 0 : index
      %27 = memref.load %arg9[%c0_13, %c0_14] : memref<1x1xf32, #tpu.memory_space<smem>>
      %28 = vector.broadcast %27 : f32 to vector<1x16xf32>
      %29 = arith.addf %26, %28 : vector<1x16xf32>
      %30 = math.tanh %29 : vector<1x16xf32>
      %c0_15 = arith.constant 0 : index
      %c0_16 = arith.constant 0 : index
      %31 = vector.load %arg11[%c0_15, %c0_16] : memref<1x16xf32, #tpu.memory_space<vmem>>, vector<1x16xf32>
      tpu.vector_store %arg11[%c0_15, %c0_16], %30 {strides = array<i32>} : memref<1x16xf32, #tpu.memory_space<vmem>>, vector<1x16xf32>,
    } else {
    }
    return
  }
  func.func @transform_0(%arg0: i32, %arg1: i32) -> (i32, i32) {
    %c0_i32 = arith.constant 0 : i32
    %c0_i32_0 = arith.constant 0 : i32
    %c0_i32_1 = arith.constant 0 : i32
    return %c0_i32, %c0_i32_0 : i32, i32
  }
  func.func @transform_1(%arg0: i32, %arg1: i32) -> (i32, i32) {
    %c0_i32 = arith.constant 0 : i32
    %c0_i32_0 = arith.constant 0 : i32
    %c0_i32_1 = arith.constant 0 : i32
    return %c0_i32, %c0_i32_0 : i32, i32
  }
  func.func @transform_2(%arg0: i32, %arg1: i32) -> (i32, i32) {
    %c0_i32 = arith.constant 0 : i32
    %c0_i32_0 = arith.constant 0 : i32
    %c0_i32_1 = arith.constant 0 : i32
    return %c0_i32, %c0_i32_0 : i32, i32
  }
  func.func @transform_3(%arg0: i32, %arg1: i32) -> (i32, i32) {
    %c0_i32 = arith.constant 0 : i32
    %c0_i32_0 = arith.constant 0 : i32
    %c0_i32_1 = arith.constant 0 : i32
    return %c0_i32, %c0_i32_0 : i32, i32
  }
  func.func @transform_4(%arg0: i32, %arg1: i32) -> (i32, i32) {
    %c0_i32 = arith.constant 0 : i32
    %c0_i32_0 = arith.constant 0 : i32
    %c0_i32_1 = arith.constant 0 : i32
    return %c0_i32, %c0_i32_0 : i32, i32
  }
  func.func @transform_5(%arg0: i32, %arg1: i32) -> (i32, i32) {
    %c0_i32 = arith.constant 0 : i32
    %c0_i32_0 = arith.constant 0 : i32
    %c0_i32_1 = arith.constant 0 : i32
    return %c0_i32, %c0_i32_0 : i32, i32
  }
  func.func @transform_6(%arg0: i32, %arg1: i32) -> (i32, i32) {
    %c0_i32 = arith.constant 0 : i32
    %c0_i32_0 = arith.constant 0 : i32
    %c0_i32_1 = arith.constant 0 : i32
    return %c0_i32, %c0_i32_0 : i32, i32
  }
  func.func @transform_7(%arg0: i32, %arg1: i32) -> (i32, i32) {
    %c0_i32 = arith.constant 0 : i32
    %c0_i32_0 = arith.constant 0 : i32
    %c0_i32_1 = arith.constant 0 : i32
    return %c0_i32, %c0_i32_0 : i32, i32
  }
  func.func @transform_8(%arg0: i32, %arg1: i32) -> (i32, i32) {
    %c0_i32 = arith.constant 0 : i32
    %c0_i32_0 = arith.constant 0 : i32
    %c0_i32_1 = arith.constant 0 : i32
    return %c0_i32, %c0_i32_0 : i32, i32
  }
  func.func @transform_9(%arg0: i32, %arg1: i32) -> (i32, i32) {
    %0 = arith.muli %arg1, %arg0 : i32
    %c0_i32 = arith.constant 0 : i32
    %c0_i32_0 = arith.constant 0 : i32
    return %c0_i32, %0 : i32, i32
  }
}

module attributes {stable_mosaic.version = 11 : i64} {
  func.func @_fused_layer_kernel(%arg0: i32, %arg1: i32, %arg2: memref<8x8xbf16, #tpu.memory_space<vmem>>, %arg3: memref<8x17xbf16, #tpu.memory_space<vmem>>, %arg4: memref<16x32xbf16, #tpu.memory_space<vmem>>, %arg5: memref<17x32xbf16, #tpu.memory_space<vmem>>, %arg6: memref<1x32xf32, #tpu.memory_space<vmem>>, %arg7: memref<1x32xf32, #tpu.memory_space<vmem>>, %arg8: memref<2x32xbf16, #tpu.memory_space<vmem>>, %arg9: memref<1x1xf32, #tpu.memory_space<smem>>, %arg10: memref<8x32xbf16, #tpu.memory_space<vmem>>, %arg11: memref<1x8xf32, #tpu.memory_space<vmem>>, %arg12: memref<1x32xf32, #tpu.memory_space<vmem>>, %arg13: memref<1x32xf32, #tpu.memory_space<vmem>>, %arg14: memref<1x8xbf16, #tpu.memory_space<vmem>>) attributes {dimension_semantics = [#tpu.dimension_semantics<arbitrary>, #tpu.dimension_semantics<arbitrary>], iteration_bounds = array<i64: 2, 1>, scalar_prefetch = 0 : i64, scratch_operands = 3 : i64, tpu.core_type = #tpu.core_type<tc>, window_params = [{pipeline_mode = #tpu.pipeline_mode<synchronous>, transform_indices = @transform_0, window_bounds = array<i64: 8, 8>}, {pipeline_mode = #tpu.pipeline_mode<synchronous>, transform_indices = @transform_1, window_bounds = array<i64: 8, 17>}, {pipeline_mode = #tpu.pipeline_mode<synchronous>, transform_indices = @transform_2, window_bounds = array<i64: 16, 32>}, {pipeline_mode = #tpu.pipeline_mode<synchronous>, transform_indices = @transform_3, window_bounds = array<i64: 17, 32>}, {pipeline_mode = #tpu.pipeline_mode<synchronous>, transform_indices = @transform_4, window_bounds = array<i64: 1, 32>}, {pipeline_mode = #tpu.pipeline_mode<synchronous>, transform_indices = @transform_5, window_bounds = array<i64: 1, 32>}, {pipeline_mode = #tpu.pipeline_mode<synchronous>, transform_indices = @transform_6, window_bounds = array<i64: 2, 32>}, {transform_indices = @transform_7, window_bounds = array<i64: 1, 1>}, {pipeline_mode = #tpu.pipeline_mode<synchronous>, transform_indices = @transform_8, window_bounds = array<i64: 8, 32>}, {transform_indices = @transform_9, window_bounds = array<i64: 1, 8>}]} {
    %c8_i32 = arith.constant 8 : i32
    %0 = arith.muli %arg1, %c8_i32 : i32
    %1 = tpu.assume_multiple %0, 8 : i32
    %c0_i32 = arith.constant 0 : i32
    %2 = arith.cmpi eq, %arg0, %c0_i32 : i32
    %c0_i32_0 = arith.constant 0 : i32
    %3 = arith.cmpi eq, %arg1, %c0_i32_0 : i32
    %4 = arith.andi %2, %3 : i1
    %5 = arith.extui %4 : i1 to i32
    %c0_i32_1 = arith.constant 0 : i32
    %6 = arith.cmpi ne, %5, %c0_i32_1 : i32
    scf.if %6 {
      %cst = arith.constant 0.000000e+00 : f32
      %18 = vector.broadcast %cst : f32 to vector<1x32xf32>
      %c0 = arith.constant 0 : index
      %c0_8 = arith.constant 0 : index
      %19 = vector.load %arg12[%c0, %c0_8] : memref<1x32xf32, #tpu.memory_space<vmem>>, vector<1x32xf32>
      tpu.vector_store %arg12[%c0, %c0_8], %18 {strides = array<i32>} : memref<1x32xf32, #tpu.memory_space<vmem>>, vector<1x32xf32>,
      %cst_9 = arith.constant 0.000000e+00 : f32
      %20 = vector.broadcast %cst_9 : f32 to vector<1x32xf32>
      %c0_10 = arith.constant 0 : index
      %c0_11 = arith.constant 0 : index
      %21 = vector.load %arg13[%c0_10, %c0_11] : memref<1x32xf32, #tpu.memory_space<vmem>>, vector<1x32xf32>
      tpu.vector_store %arg13[%c0_10, %c0_11], %20 {strides = array<i32>} : memref<1x32xf32, #tpu.memory_space<vmem>>, vector<1x32xf32>,
    } else {
    }
    %c0_i32_2 = arith.constant 0 : i32
    %7 = arith.cmpi eq, %arg0, %c0_i32_2 : i32
    %8 = arith.extui %7 : i1 to i32
    %c0_i32_3 = arith.constant 0 : i32
    %9 = arith.cmpi ne, %8, %c0_i32_3 : i32
    scf.if %9 {
      %18 = arith.index_cast %1 : i32 to index
      %c0 = arith.constant 0 : index
      %19 = vector.load %arg2[%18, %c0] : memref<8x8xbf16, #tpu.memory_space<vmem>>, vector<8x8xbf16>
      %c0_8 = arith.constant 0 : index
      %c0_9 = arith.constant 0 : index
      %20 = vector.load %arg3[%c0_8, %c0_9] : memref<8x17xbf16, #tpu.memory_space<vmem>>, vector<8x17xbf16>
      %cst = arith.constant dense<0.000000e+00> : vector<8x17xf32>
      %21 = tpu.matmul %19, %20, %cst {dimension_numbers = #tpu.dot_dimension_numbers<[1], [0], [0], [1], [0, 0, 1, 1], [], []>} : vector<8x8xbf16>, vector<8x17xbf16>, vector<8x17xf32> -> vector<8x17xf32>
      %22 = vector.extract_strided_slice %21 {offsets = [0, 16], sizes = [8, 1], strides = [1, 1]} : vector<8x17xf32> to vector<8x1xf32>
      %cst_10 = arith.constant 1.000000e+00 : f32
      %23 = vector.broadcast %cst_10 : f32 to vector<8x1xf32>
      %24 = arith.maximumf %22, %23 : vector<8x1xf32>
      %cst_11 = arith.constant 1.000000e+00 : f32
      %25 = vector.broadcast %cst_11 : f32 to vector<8x1xf32>
      %26 = arith.divf %25, %24 : vector<8x1xf32>
      %27 = vector.extract_strided_slice %21 {offsets = [0, 0], sizes = [8, 16], strides = [1, 1]} : vector<8x17xf32> to vector<8x16xf32>
      %28 = vector.broadcast %26 : vector<8x1xf32> to vector<8x16xf32>
      %29 = arith.mulf %27, %28 : vector<8x16xf32>
      %30 = arith.truncf %29 : vector<8x16xf32> to vector<8x16xbf16>
      %31 = arith.index_cast %1 : i32 to index
      %c0_12 = arith.constant 0 : index
      %32 = vector.load %arg3[%31, %c0_12] : memref<8x17xbf16, #tpu.memory_space<vmem>>, vector<8x17xbf16>
      %c0_13 = arith.constant 0 : index
      %c0_14 = arith.constant 0 : index
      %33 = vector.load %arg4[%c0_13, %c0_14] : memref<16x32xbf16, #tpu.memory_space<vmem>>, vector<16x32xbf16>
      %cst_15 = arith.constant dense<0.000000e+00> : vector<8x32xf32>
      %34 = tpu.matmul %30, %33, %cst_15 {dimension_numbers = #tpu.dot_dimension_numbers<[1], [0], [0], [1], [0, 0, 1, 1], [], []>} : vector<8x16xbf16>, vector<16x32xbf16>, vector<8x32xf32> -> vector<8x32xf32>
      %c0_16 = arith.constant 0 : index
      %c0_17 = arith.constant 0 : index
      %35 = vector.load %arg5[%c0_16, %c0_17] : memref<17x32xbf16, #tpu.memory_space<vmem>>, vector<17x32xbf16>
      %cst_18 = arith.constant dense<0.000000e+00> : vector<8x32xf32>
      %36 = tpu.matmul %32, %35, %cst_18 {dimension_numbers = #tpu.dot_dimension_numbers<[1], [0], [0], [1], [0, 0, 1, 1], [], []>} : vector<8x17xbf16>, vector<17x32xbf16>, vector<8x32xf32> -> vector<8x32xf32>
      %37 = arith.addf %34, %36 : vector<8x32xf32>
      %38 = arith.truncf %37 : vector<8x32xf32> to vector<8x32xbf16>
      %39 = arith.index_cast %1 : i32 to index
      %c0_19 = arith.constant 0 : index
      %40 = vector.load %arg10[%39, %c0_19] : memref<8x32xbf16, #tpu.memory_space<vmem>>, vector<8x32xbf16>
      tpu.vector_store %arg10[%39, %c0_19], %38 {strides = array<i32>} : memref<8x32xbf16, #tpu.memory_space<vmem>>, vector<8x32xbf16>,
      %c0_20 = arith.constant 0 : index
      %c0_21 = arith.constant 0 : index
      %41 = vector.load %arg12[%c0_20, %c0_21] : memref<1x32xf32, #tpu.memory_space<vmem>>, vector<1x32xf32>
      %cst_22 = arith.constant dense<0.000000e+00> : vector<32xf32>
      %42 = vector.multi_reduction <add>, %37, %cst_22 [0] : vector<8x32xf32> to vector<32xf32>
      %43 = vector.shape_cast %42 : vector<32xf32> to vector<1x32xf32>
      %44 = arith.addf %41, %43 : vector<1x32xf32>
      %c0_23 = arith.constant 0 : index
      %c0_24 = arith.constant 0 : index
      %45 = vector.load %arg12[%c0_23, %c0_24] : memref<1x32xf32, #tpu.memory_space<vmem>>, vector<1x32xf32>
      tpu.vector_store %arg12[%c0_23, %c0_24], %44 {strides = array<i32>} : memref<1x32xf32, #tpu.memory_space<vmem>>, vector<1x32xf32>,
      %c0_25 = arith.constant 0 : index
      %c0_26 = arith.constant 0 : index
      %46 = vector.load %arg13[%c0_25, %c0_26] : memref<1x32xf32, #tpu.memory_space<vmem>>, vector<1x32xf32>
      %47 = arith.mulf %37, %37 : vector<8x32xf32>
      %cst_27 = arith.constant dense<0.000000e+00> : vector<32xf32>
      %48 = vector.multi_reduction <add>, %47, %cst_27 [0] : vector<8x32xf32> to vector<32xf32>
      %49 = vector.shape_cast %48 : vector<32xf32> to vector<1x32xf32>
      %50 = arith.addf %46, %49 : vector<1x32xf32>
      %c0_28 = arith.constant 0 : index
      %c0_29 = arith.constant 0 : index
      %51 = vector.load %arg13[%c0_28, %c0_29] : memref<1x32xf32, #tpu.memory_space<vmem>>, vector<1x32xf32>
      tpu.vector_store %arg13[%c0_28, %c0_29], %50 {strides = array<i32>} : memref<1x32xf32, #tpu.memory_space<vmem>>, vector<1x32xf32>,
    } else {
    }
    %c0_i32_4 = arith.constant 0 : i32
    %10 = arith.cmpi eq, %arg0, %c0_i32_4 : i32
    %c0_i32_5 = arith.constant 0 : i32
    %11 = arith.cmpi eq, %arg1, %c0_i32_5 : i32
    %12 = arith.andi %10, %11 : i1
    %13 = arith.extui %12 : i1 to i32
    %c0_i32_6 = arith.constant 0 : i32
    %14 = arith.cmpi ne, %13, %c0_i32_6 : i32
    scf.if %14 {
      %c0 = arith.constant 0 : index
      %c0_8 = arith.constant 0 : index
      %18 = vector.load %arg12[%c0, %c0_8] : memref<1x32xf32, #tpu.memory_space<vmem>>, vector<1x32xf32>
      %cst = arith.constant 1.250000e-01 : f32
      %19 = vector.broadcast %cst : f32 to vector<1x32xf32>
      %20 = arith.mulf %18, %19 : vector<1x32xf32>
      %c0_9 = arith.constant 0 : index
      %c0_10 = arith.constant 0 : index
      %21 = vector.load %arg13[%c0_9, %c0_10] : memref<1x32xf32, #tpu.memory_space<vmem>>, vector<1x32xf32>
      %cst_11 = arith.constant 1.250000e-01 : f32
      %22 = vector.broadcast %cst_11 : f32 to vector<1x32xf32>
      %23 = arith.mulf %21, %22 : vector<1x32xf32>
      %24 = arith.mulf %20, %20 : vector<1x32xf32>
      %25 = arith.subf %23, %24 : vector<1x32xf32>
      %cst_12 = arith.constant 0.000000e+00 : f32
      %26 = vector.broadcast %cst_12 : f32 to vector<1x32xf32>
      %27 = arith.maximumf %25, %26 : vector<1x32xf32>
      %cst_13 = arith.constant 9.99999974E-6 : f32
      %28 = vector.broadcast %cst_13 : f32 to vector<1x32xf32>
      %29 = arith.addf %27, %28 : vector<1x32xf32>
      %30 = math.rsqrt %29 : vector<1x32xf32>
      %c0_14 = arith.constant 0 : index
      %c0_15 = arith.constant 0 : index
      %31 = vector.load %arg6[%c0_14, %c0_15] : memref<1x32xf32, #tpu.memory_space<vmem>>, vector<1x32xf32>
      %32 = arith.mulf %30, %31 : vector<1x32xf32>
      %c0_16 = arith.constant 0 : index
      %c0_17 = arith.constant 0 : index
      %33 = vector.load %arg7[%c0_16, %c0_17] : memref<1x32xf32, #tpu.memory_space<vmem>>, vector<1x32xf32>
      %34 = arith.mulf %20, %32 : vector<1x32xf32>
      %35 = arith.subf %33, %34 : vector<1x32xf32>
      %c0_i32_18 = arith.constant 0 : i32
      %c8_i32_19 = arith.constant 8 : i32
      %36 = arith.muli %c0_i32_18, %c8_i32_19 : i32
      %37 = tpu.assume_multiple %36, 8 : i32
      %38 = arith.index_cast %37 : i32 to index
      %c0_20 = arith.constant 0 : index
      %39 = vector.load %arg10[%38, %c0_20] : memref<8x32xbf16, #tpu.memory_space<vmem>>, vector<8x32xbf16>
      %40 = arith.extf %39 : vector<8x32xbf16> to vector<8x32xf32>
      %41 = vector.broadcast %32 : vector<1x32xf32> to vector<8x32xf32>
      %42 = arith.mulf %40, %41 : vector<8x32xf32>
      %43 = vector.broadcast %35 : vector<1x32xf32> to vector<8x32xf32>
      %44 = arith.addf %42, %43 : vector<8x32xf32>
      %cst_21 = arith.constant 0.000000e+00 : f32
      %45 = vector.broadcast %cst_21 : f32 to vector<8x32xf32>
      %46 = arith.maximumf %44, %45 : vector<8x32xf32>
      %47 = arith.truncf %46 : vector<8x32xf32> to vector<8x32xbf16>
      %48 = arith.index_cast %37 : i32 to index
      %c0_22 = arith.constant 0 : index
      %49 = vector.load %arg10[%48, %c0_22] : memref<8x32xbf16, #tpu.memory_space<vmem>>, vector<8x32xbf16>
      tpu.vector_store %arg10[%48, %c0_22], %47 {strides = array<i32>} : memref<8x32xbf16, #tpu.memory_space<vmem>>, vector<8x32xbf16>,
      %c1_i32_23 = arith.constant 1 : i32
      %c0_24 = arith.constant 0 : index
      %c0_25 = arith.constant 0 : index
      %50 = vector.load %arg8[%c0_24, %c0_25] : memref<2x32xbf16, #tpu.memory_space<vmem>>, vector<1x32xbf16>
      %c0_26 = arith.constant 0 : index
      %c0_27 = arith.constant 0 : index
      %51 = vector.load %arg10[%c0_26, %c0_27] : memref<8x32xbf16, #tpu.memory_space<vmem>>, vector<8x32xbf16>
      %cst_28 = arith.constant dense<0.000000e+00> : vector<1x8xf32>
      %52 = tpu.matmul %50, %51, %cst_28 {dimension_numbers = #tpu.dot_dimension_numbers<[1], [1], [0], [0], [0, 0, 1, 0], [], []>} : vector<1x32xbf16>, vector<8x32xbf16>, vector<1x8xf32> -> vector<1x8xf32>
      %53 = arith.truncf %52 : vector<1x8xf32> to vector<1x8xbf16>
      %c0_29 = arith.constant 0 : index
      %c0_30 = arith.constant 0 : index
      %54 = vector.load %arg14[%c0_29, %c0_30] : memref<1x8xbf16, #tpu.memory_space<vmem>>, vector<1x8xbf16>
      tpu.vector_store %arg14[%c0_29, %c0_30], %53 {strides = array<i32>} : memref<1x8xbf16, #tpu.memory_space<vmem>>, vector<1x8xbf16>,
    } else {
    }
    %c1_i32 = arith.constant 1 : i32
    %15 = arith.cmpi eq, %arg0, %c1_i32 : i32
    %16 = arith.extui %15 : i1 to i32
    %c0_i32_7 = arith.constant 0 : i32
    %17 = arith.cmpi ne, %16, %c0_i32_7 : i32
    scf.if %17 {
      %18 = arith.index_cast %1 : i32 to index
      %c0 = arith.constant 0 : index
      %19 = vector.load %arg2[%18, %c0] : memref<8x8xbf16, #tpu.memory_space<vmem>>, vector<8x8xbf16>
      %20 = arith.index_cast %1 : i32 to index
      %c0_8 = arith.constant 0 : index
      %21 = vector.load %arg10[%20, %c0_8] : memref<8x32xbf16, #tpu.memory_space<vmem>>, vector<8x32xbf16>
      %c0_9 = arith.constant 0 : index
      %c0_10 = arith.constant 0 : index
      %22 = vector.load %arg14[%c0_9, %c0_10] : memref<1x8xbf16, #tpu.memory_space<vmem>>, vector<1x8xbf16>
      %cst = arith.constant dense<0.000000e+00> : vector<1x8xf32>
      %23 = tpu.matmul %22, %19, %cst {dimension_numbers = #tpu.dot_dimension_numbers<[1], [1], [0], [0], [0, 0, 1, 0], [], []>} : vector<1x8xbf16>, vector<8x8xbf16>, vector<1x8xf32> -> vector<1x8xf32>
      %c1 = arith.constant 1 : index
      %c0_11 = arith.constant 0 : index
      %24 = vector.load %arg8[%c1, %c0_11] : memref<2x32xbf16, #tpu.memory_space<vmem>>, vector<1x32xbf16>
      %cst_12 = arith.constant dense<0.000000e+00> : vector<1x8xf32>
      %25 = tpu.matmul %24, %21, %cst_12 {dimension_numbers = #tpu.dot_dimension_numbers<[1], [1], [0], [0], [0, 0, 1, 0], [], []>} : vector<1x32xbf16>, vector<8x32xbf16>, vector<1x8xf32> -> vector<1x8xf32>
      %26 = arith.addf %23, %25 : vector<1x8xf32>
      %c0_13 = arith.constant 0 : index
      %c0_14 = arith.constant 0 : index
      %27 = memref.load %arg9[%c0_13, %c0_14] : memref<1x1xf32, #tpu.memory_space<smem>>
      %28 = vector.broadcast %27 : f32 to vector<1x8xf32>
      %29 = arith.addf %26, %28 : vector<1x8xf32>
      %30 = math.tanh %29 : vector<1x8xf32>
      %c0_15 = arith.constant 0 : index
      %c0_16 = arith.constant 0 : index
      %31 = vector.load %arg11[%c0_15, %c0_16] : memref<1x8xf32, #tpu.memory_space<vmem>>, vector<1x8xf32>
      tpu.vector_store %arg11[%c0_15, %c0_16], %30 {strides = array<i32>} : memref<1x8xf32, #tpu.memory_space<vmem>>, vector<1x8xf32>,
    } else {
    }
    return
  }
  func.func @transform_0(%arg0: i32, %arg1: i32) -> (i32, i32) {
    %c0_i32 = arith.constant 0 : i32
    %c0_i32_0 = arith.constant 0 : i32
    %c0_i32_1 = arith.constant 0 : i32
    return %c0_i32, %c0_i32_0 : i32, i32
  }
  func.func @transform_1(%arg0: i32, %arg1: i32) -> (i32, i32) {
    %c0_i32 = arith.constant 0 : i32
    %c0_i32_0 = arith.constant 0 : i32
    %c0_i32_1 = arith.constant 0 : i32
    return %c0_i32, %c0_i32_0 : i32, i32
  }
  func.func @transform_2(%arg0: i32, %arg1: i32) -> (i32, i32) {
    %c0_i32 = arith.constant 0 : i32
    %c0_i32_0 = arith.constant 0 : i32
    %c0_i32_1 = arith.constant 0 : i32
    return %c0_i32, %c0_i32_0 : i32, i32
  }
  func.func @transform_3(%arg0: i32, %arg1: i32) -> (i32, i32) {
    %c0_i32 = arith.constant 0 : i32
    %c0_i32_0 = arith.constant 0 : i32
    %c0_i32_1 = arith.constant 0 : i32
    return %c0_i32, %c0_i32_0 : i32, i32
  }
  func.func @transform_4(%arg0: i32, %arg1: i32) -> (i32, i32) {
    %c0_i32 = arith.constant 0 : i32
    %c0_i32_0 = arith.constant 0 : i32
    %c0_i32_1 = arith.constant 0 : i32
    return %c0_i32, %c0_i32_0 : i32, i32
  }
  func.func @transform_5(%arg0: i32, %arg1: i32) -> (i32, i32) {
    %c0_i32 = arith.constant 0 : i32
    %c0_i32_0 = arith.constant 0 : i32
    %c0_i32_1 = arith.constant 0 : i32
    return %c0_i32, %c0_i32_0 : i32, i32
  }
  func.func @transform_6(%arg0: i32, %arg1: i32) -> (i32, i32) {
    %c0_i32 = arith.constant 0 : i32
    %c0_i32_0 = arith.constant 0 : i32
    %c0_i32_1 = arith.constant 0 : i32
    return %c0_i32, %c0_i32_0 : i32, i32
  }
  func.func @transform_7(%arg0: i32, %arg1: i32) -> (i32, i32) {
    %c0_i32 = arith.constant 0 : i32
    %c0_i32_0 = arith.constant 0 : i32
    %c0_i32_1 = arith.constant 0 : i32
    return %c0_i32, %c0_i32_0 : i32, i32
  }
  func.func @transform_8(%arg0: i32, %arg1: i32) -> (i32, i32) {
    %c0_i32 = arith.constant 0 : i32
    %c0_i32_0 = arith.constant 0 : i32
    %c0_i32_1 = arith.constant 0 : i32
    return %c0_i32, %c0_i32_0 : i32, i32
  }
  func.func @transform_9(%arg0: i32, %arg1: i32) -> (i32, i32) {
    %0 = arith.muli %arg1, %arg0 : i32
    %c0_i32 = arith.constant 0 : i32
    %c0_i32_0 = arith.constant 0 : i32
    return %c0_i32, %0 : i32, i32
  }
}

</mosaic_0001>

<bundles_post_ra>
// kernel: net_forward.2
= control target key start
LH: loop header
LB: loop body
LE: loop exit
PB: predicated region body
PF: predicated region fallthrough
CT: control target
= control target key end

     0   :  { %s911_s11 = smov 0   ;;  %s913_s12 = smov 0   ;;  %s1009_s0 = inlined_call_operand.vmem [shape: bf16[16,16], index: 0, kind: input, shape index: {}]   ;;  %s1010_s1 = inlined_call_operand.vmem [shape: bf16[16,9], index: 1, kind: input, shape index: {}]   ;;  %s1011_s2 = inlined_call_operand.vmem [shape: bf16[8,16], index: 2, kind: input, shape index: {}]   ;;  %s1012_s3 = inlined_call_operand.vmem [shape: bf16[9,16], index: 3, kind: input, shape index: {}]   ;;  %s1013_s4 = inlined_call_operand.vmem [shape: f32[1,16], index: 4, kind: input, shape index: {}]   ;;  %s1014_s5 = inlined_call_operand.vmem [shape: f32[1,16], index: 5, kind: input, shape index: {}]   ;;  %s1015_s6 = inlined_call_operand.vmem [shape: bf16[2,16], index: 6, kind: input, shape index: {}]   ;;  %s1016_s7 = inlined_call_operand.<no memory space> [shape: f32[1,1], index: 7, kind: input, shape index: {}]   ;;  %s1017_s8 = inlined_call_operand.vmem [shape: bf16[16,16], index: 8, kind: output, shape index: {0}]   ;;  %s1018_s9 = inlined_call_operand.vmem [shape: f32[1,16], index: 9, kind: output, shape index: {1}]  }
   0x1   :  { %15 = sst [smem:[#allocation5]] %s1016_s7  ;;  %s915_s13 = smov 0  }
   0x2 LB: > { %s33_s7 = sadd.s32 1, %s849_s12  ;;  %p741_p0 = scmp.ge.s32.totalorder %s853_s13, 1  ;;  %s853_s13 = sphi %s915_s13, %s21_s13   ;;  %s849_s12 = sphi %s913_s12, %s1020_s12   ;;  %s845_s11 = sphi %s911_s11, %s1019_s11  }
   0x3   : > { %p35_p1 = scmp.ge.s32.totalorder %s33_s7, 2  ;;  %p290_p2 = scmp.lt.s32.totalorder %s853_s13, 3 }
   0x5   : > { %s1022_s7 = smov (%p35_p1, %s33_s7), 0  ;;  %p291_p3 = pnand %p741_p0, %p290_p2 }
   0x6   : > { %p327_p4 = scmp.eq.s32.totalorder (!%p291_p3), %s845_s11, 0 }
   0x7   : > { %294 = sbr.rel (%p291_p3) target bundleno = 818 (0x332), region = 52 }
   0xc   : > { %332 = sbr.rel (!%p327_p4) target bundleno = 17 (0x11), region = 56  ;;  %vm333_vm0 = vcmask (%p327_p4), 122880   ;;  %v855_v0 = vmov (%p327_p4), 0.0  }
   0xd   : > { %334 = vst.msk [vmem:[#allocation2] sm:$0x1] (%p327_p4), %vm333_vm0, %v855_v0 }
   0xe   : > { %335 = vst.msk [vmem:[#allocation3] sm:$0x1] (%p327_p4), %vm333_vm0, %v855_v0 }
  0x11 PF: > { %p743_p5 = scmp.ne.s32.totalorder %s845_s11, 0 }
  0x13   : > { %338 = sbr.rel (%p743_p5) target bundleno = 462 (0x1ce), region = 60 }
  0x18   : > { %v785_v1 = vld [vmem:[%s1010_s1] sm:$0xff]  ;;  %vm358_vm1 = vcmask 130048   ;;  %v856_v3 = vmov 8   ;;  %vm442_vm10 = vcmask 1043456   ;;  %vm443_vm11 = vcmask 1044480  }
  0x19   : > { %v784_v2 = vld [vmem:[%s1009_s0] sm:$0xff]  ;;  %369 = vmatpush.bf16.msra.mxu0 %v785_v1  ;;  %822 = vset.pattern.permute.xlu0 %v856_v3  ;;  %v857_v31 = vmov 65535   ;;  %vm438_vm12 = vcmask 72704   ;;  %vm463_vm13 = vcmask 64512   ;;  %vm488_vm14 = vcmask 125952  }
  0x1a   : > { %v759_v28 = vld [vmem:[%s1012_s3] sm:$0xf]  ;;  %v787_v29 = vld [vmem:[%s1012_s3] sm:$0x10]  ;;  %v444_v32 = vsel %vm442_vm10, 4294967295, %v857_v31  ;;  %vm502_vm15 = vcmask 122880  }
  0x1b   : > { %v760_v30 = vor.u32 %v787_v29, %v759_v28  ;;  %v445_v33 = vsel %vm443_vm11, %v444_v32, 0  ;;  %v425_v35 = vld [vmem:[%s1011_s2] sm:$0xf] }
  0x1c   : > { %752 = vmatmul.msk.bf16.vlgmr.msra.gmra.mxu0 %vm358_vm1, %v784_v2  ;;  %v468_v36 = vsel %vm442_vm10, %v425_v35, 0  ;;  %v786_v37 = vld [vmem:[%s1010_s1] sm:$0xff] }
  0x1d   : > { %v447_v34 = vand.u32 %v760_v30, %v445_v33  ;;  %477 = vmatpush.bf16.msra.mxu2 %v468_v36 }
  0x1f   : > { %456 = vmatpush.bf16.msra.mxu1 %v447_v34 }
  0x22   : > { %761 = vmatmul.msk.bf16.vlgmr.msra.gmra.mxu1 %vm438_vm12, %v786_v37 }
  0x99   : > { %v371_v4 = vpop.f32.mrf.mxu0 }
  0x9a   : > { %v376_v5 = vmax.f32 %v371_v4, 1.0 }
  0x9c   : > { %823 = vrcp.f32 %v376_v5  ;;  %v389_v11 = vand.u32 2147483648, %v376_v5  ;;  %v387_v13 = vand.u32 2147483647, %v376_v5  ;;  %vm383_vm3 = vweird.f32 %v376_v5 }
  0x9e   : > { %v390_v16 = vor.u32 1.1754944e-38, %v389_v11  ;;  %vm388_vm5 = vcmp.eq.f32.partialorder %v387_v13, 8.507059e+37 }
  0x9f   : > { %v458_v43 = vpop.f32.mrf.mxu1 }
  0xa1   : > { %v373_v6 = vpop.f32.mrf.mxu0 }
  0xa2   : > { %v824_v7 = vpop.eup %823  ;;  %v377_v8 = vmax.f32 %v373_v6, 1.0 }
  0xa3   : > { %v379_v9 = vmul.f32 %v824_v7, %v376_v5  ;;  %vm384_vm2 = vweird.f32 %v824_v7 }
  0xa4   : > { %825 = vrcp.f32 %v377_v8  ;;  %vm385_vm4 = vmor %vm383_vm3, %vm384_vm2  ;;  %v404_v21 = vand.u32 2147483648, %v377_v8  ;;  %v402_v23 = vand.u32 2147483647, %v377_v8  ;;  %vm398_vm7 = vweird.f32 %v377_v8 }
  0xa5   : > { %v380_v10 = vsub.f32 1.0, %v379_v9 }
  0xa6   : > { %v405_v25 = vor.u32 1.1754944e-38, %v404_v21  ;;  %vm403_vm9 = vcmp.eq.f32.partialorder %v402_v23, 8.507059e+37 }
  0xa7   : > { %v381_v12 = vmul.f32 %v824_v7, %v380_v10  ;;  %v460_v47 = vpop.f32.mrf.mxu1 }
  0xa9   : > { %v382_v14 = vadd.f32 %v824_v7, %v381_v12 }
  0xaa   : > { %v826_v15 = vpop.eup %825 }
  0xab   : > { %v386_v17 = vsel %vm385_vm4, %v824_v7, %v382_v14  ;;  %v394_v18 = vmul.f32 %v826_v15, %v377_v8  ;;  %vm399_vm6 = vweird.f32 %v826_v15  ;;  %v504_v7 = vld [vmem:[#allocation3] sm:$0x1] }
  0xac   : > { %v391_v19 = vsel %vm388_vm5, %v390_v16, %v386_v17  ;;  %vm400_vm8 = vmor %vm398_vm7, %vm399_vm6 }
  0xad   : > { %410 = vperm.xlu0 %822, %v391_v19   ;;  %v395_v20 = vsub.f32 1.0, %v394_v18 }
  0xaf   : > { %v396_v22 = vmul.f32 %v826_v15, %v395_v20 }
  0xb1   : > { %v397_v24 = vadd.f32 %v826_v15, %v396_v22 }
  0xb3   : > { %v401_v26 = vsel %vm400_vm8, %v826_v15, %v397_v24 }
  0xb4   : > { %v406_v27 = vsel %vm403_vm9, %v405_v25, %v401_v26 }
  0xb5   : > { %415 = vperm.xlu0 %822, %v406_v27  }
 0x11f   : > { %v411_v38 = vpop.permute.xlu0 %410 }
 0x120   : > { %v418_v40 = vmul.f32 %v411_v38, %v371_v4  ;;  %v491_v4 = vld [vmem:[#allocation2] sm:$0x1] }
 0x127   : > { %v416_v39 = vpop.permute.xlu0 %415 }
 0x128   : > { %v419_v41 = vmul.f32 %v416_v39, %v373_v6 }
 0x12a   : > { %v420_v42 = vpack.c.bf16 %v419_v41, %v418_v40 }
 0x12c   : > { %762 = vmatmul.msk.bf16.vlgmr.msra.gmra.mxu2 %vm463_vm13, %v420_v42 }
 0x1af   : > { %v479_v44 = vpop.f32.mrf.mxu2 }
 0x1b0   : > { %v480_v45 = vadd.f32 %v479_v44, %v458_v43 }
 0x1b2   : > { %v484_v46 = vpack.c.bf16 %v480_v45, %v480_v45  ;;  %v505_v49 = vmul.f32 %v480_v45, %v480_v45  ;;  %v492_v51 = vsel %vm358_vm1, %v480_v45, 0.0 }
 0x1b4   : > { %489 = vst.msk [vmem:[%s1017_s8] sm:$0xf] %vm488_vm14, %v484_v46  ;;  %v507_v56 = vsel %vm358_vm1, %v505_v49, 0.0 }
 0x1b7   : > { %v481_v48 = vpop.f32.mrf.mxu2 }
 0x1b8   : > { %v482_v50 = vadd.f32 %v481_v48, %v460_v47 }
 0x1ba   : > { %v485_v52 = vpack.c.bf16 %v482_v50, %v482_v50  ;;  %v493_v53 = vsel %vm358_vm1, %v482_v50, 0.0  ;;  %v506_v54 = vmul.f32 %v482_v50, %v482_v50 }
 0x1bb   : > { %v494_v55 = vadd.f32 %v493_v53, %v492_v51 }
 0x1bc   : > { %490 = vst.msk [vmem:[%s1017_s8 + $0x4] sm:$0xf] %vm488_vm14, %v485_v52  ;;  %v508_v57 = vsel %vm358_vm1, %v506_v54, 0.0 }
 0x1bd   : > { %v495_v58 = vrot.slane %v494_v55, 4  ;;  %v509_v59 = vadd.f32 %v508_v57, %v507_v56 }
 0x1bf   : > { %v496_v60 = vadd.f32 %v495_v58, %v494_v55  ;;  %v510_v61 = vrot.slane %v509_v59, 4 }
 0x1c1   : > { %v497_v62 = vrot.slane %v496_v60, 2  ;;  %v511_v63 = vadd.f32 %v510_v61, %v509_v59 }
 0x1c3   : > { %v498_v0 = vadd.f32 %v497_v62, %v496_v60  ;;  %v512_v1 = vrot.slane %v511_v63, 2 }
 0x1c5   : > { %v499_v2 = vrot.slane %v498_v0, 1  ;;  %v513_v3 = vadd.f32 %v512_v1, %v511_v63 }
 0x1c7   : > { %v500_v5 = vadd.f32 %v499_v2, %v498_v0  ;;  %v514_v6 = vrot.slane %v513_v3, 1 }
 0x1c9   : > { %v501_v8 = vadd.f32 %v500_v5, %v491_v4  ;;  %v515_v9 = vadd.f32 %v514_v6, %v513_v3 }
 0x1cb   : > { %503 = vst.msk [vmem:[#allocation2] sm:$0x1] %vm502_vm15, %v501_v8  ;;  %v516_v10 = vadd.f32 %v515_v9, %v504_v7 }
 0x1cd   : > { %517 = vst.msk [vmem:[#allocation3] sm:$0x1] %vm502_vm15, %v516_v10 }
 0x1ce PF: > { %519 = sbr.rel (!%p327_p4) target bundleno = 660 (0x294), region = 64  ;;  %v538_v25 = vld [vmem:[%s1013_s4] sm:$0x1] (%p327_p4)  ;;  %vm561_vm3 = vcmask (%p327_p4), 125952   ;;  %vm572_vm4 = vcmask (%p327_p4), 130048   ;;  %vm593_vm5 = vcmask (%p327_p4), 122880  }
 0x1cf   : > { %v792_v26 = vld [vmem:[%s1017_s8] sm:$0xff] (%p327_p4)   ;;  %vm594_vm6 = vsmask.f32 (%p327_p4), 256  ;;  %v596_v48 = vld [vmem:[#allocation4] sm:$0x1] (%p327_p4) }
 0x1d0   : > { %v793_v29 = vunpack.c.l.bf16 (%p327_p4), %v792_v26  ;;  %v794_v30 = vunpack.c.h.bf16 (%p327_p4), %v792_v26  ;;  %v540_v31 = vld [vmem:[%s1014_s5] sm:$0x1] (%p327_p4)  ;;  %vm595_vm7 = vmand (%p327_p4), %vm593_vm5, %vm594_vm6 }
 0x1d1   : > { %v564_v46 = vld [vmem:[%s1015_s6] sm:$0x1] (%p327_p4) }
 0x1d2   : > { %v520_v11 = vld [vmem:[#allocation2] sm:$0x1] (%p327_p4) }
 0x1d3   : > { %v521_v13 = vmul.f32 0.0625, %v520_v11 }
 0x1d4   : > { %v522_v12 = vld [vmem:[#allocation3] sm:$0x1] }
 0x1d5   : > { %v523_v14 = vmul.f32 0.0625, %v522_v12  ;;  %v524_v15 = vmul.f32 %v521_v13, %v521_v13 }
 0x1d7   : > { %v525_v16 = vsub.f32 %v523_v14, %v524_v15 }
 0x1d9   : > { %v526_v17 = vmax.f32 %v525_v16, 0.0 }
 0x1db   : > { %v527_v18 = vadd.f32 1e-05, %v526_v17 }
 0x1dd   : > { %827 = vrsqrt.f32 %v527_v18  ;;  %vm534_vm0 = vweird.f32 %v527_v18 }
 0x1e3   : > { %v828_v19 = vpop.eup %827 }
 0x1e4   : > { %v529_v20 = vmul.f32 %v828_v19, %v527_v18  ;;  %vm535_vm1 = vweird.f32 %v828_v19 }
 0x1e5   : > { %vm536_vm2 = vmor %vm534_vm0, %vm535_vm1 }
 0x1e6   : > { %v530_v21 = vmul.f32 %v828_v19, %v529_v20 }
 0x1e8   : > { %v531_v22 = vmul.f32 0.5, %v530_v21 }
 0x1ea   : > { %v532_v23 = vsub.f32 1.5, %v531_v22 }
 0x1ec   : > { %v533_v24 = vmul.f32 %v828_v19, %v532_v23 }
 0x1ee   : > { %v537_v27 = vsel %vm536_vm2, %v828_v19, %v533_v24 }
 0x1ef   : > { %v539_v28 = vmul.f32 %v538_v25, %v537_v27 }
 0x1f1   : > { %v541_v32 = vmul.f32 %v539_v28, %v521_v13  ;;  %v548_v33 = vperm.slane %v539_v28, 0 }
 0x1f3   : > { %v542_v34 = vsub.f32 %v540_v31, %v541_v32  ;;  %v550_v35 = vmul.f32 %v793_v29, %v548_v33  ;;  %v551_v36 = vmul.f32 %v794_v30, %v548_v33 }
 0x1f5   : > { %v553_v37 = vperm.slane %v542_v34, 0 }
 0x1f7   : > { %v555_v38 = vadd.f32 %v553_v37, %v550_v35  ;;  %v556_v39 = vadd.f32 %v553_v37, %v551_v36 }
 0x1f9   : > { %v557_v40 = vmax.f32 %v555_v38, 0.0  ;;  %v558_v41 = vmax.f32 %v556_v39, 0.0 }
 0x1fb   : > { %v559_v42 = vpack.c.bf16 %v557_v40, %v557_v40  ;;  %v560_v43 = vpack.c.bf16 %v558_v41, %v558_v41 }
 0x1fd   : > { %562 = vst.msk [vmem:[%s1017_s8] sm:$0xf] %vm561_vm3, %v559_v42 }
 0x1fe   : > { %563 = vst.msk [vmem:[%s1017_s8 + $0x4] sm:$0xf] %vm561_vm3, %v560_v43 }
 0x205   : > { %v788_v44 = vld [vmem:[%s1017_s8] sm:$0xff] }
 0x206   : > { %v577_v45 = vsel %vm572_vm4, %v788_v44, 0 }
 0x207   : > { %586 = vmatpush.bf16.xpose.msra.mxu0 %v577_v45 }
 0x20e   : > { %767 = vmatmul.msk.bf16.vlgmr.msra.gmra.mxu0 %vm572_vm4, %v564_v46 }
 0x28b   : > { %v588_v47 = vpop.f32.mrf.mxu0 }
 0x28c   : > { %v592_v49 = vpack.c.bf16 %v588_v47, %v588_v47 }
 0x28e   : > { %v597_v50 = vsel %vm595_vm7, %v592_v49, %v596_v48 }
 0x28f   : > { %598 = vst [vmem:[#allocation4] sm:$0x1] %v597_v50 }
 0x293   : > { %v590_v51 = vpop.f32.mrf.mxu0 }
 0x294 PF: > { %p768_p6 = scmp.ne.s32.totalorder %s845_s11, 1 }
 0x295   : > { %s669_s11 = sld [smem:[#allocation5]] (!%p768_p6) }
 0x296   : > { %602 = sbr.rel (%p768_p6) target bundleno = 818 (0x332), region = 68 }
 0x29b   : > { %v790_v52 = vld [vmem:[%s1017_s8] sm:$0xff]  ;;  %vm625_vm8 = vcmask 130048   ;;  %v613_v57 = vld [vmem:[#allocation4] sm:$0x1]  ;;  %v670_v62 = vstv %s669_s11  ;;  %vm673_vm9 = vcmask 122880  }
 0x29c   : > { %v789_v53 = vld [vmem:[%s1009_s0] sm:$0xff]  ;;  %v630_v55 = vsel %vm625_vm8, %v790_v52, 0 }
 0x29d   : > { %v614_v54 = vld [vmem:[%s1015_s6] sm:$0x1]  ;;  %v654_v56 = vsel %vm625_vm8, %v789_v53, 0  ;;  %639 = vmatpush.bf16.xpose.msra.mxu0 %v630_v55 }
 0x29e   : > { %616 = vst [vmem:[#allocation1] ss:$9 sm:$0xff] %v614_v54  ;;  %663 = vmatpush.bf16.xpose.msra.mxu1 %v654_v56 }
 0x2a5   : > { %v617_v58 = vld [vmem:[#allocation1] sm:$0xff]  ;;  %778 = vmatmul.msk.bf16.vlgmr.msra.gmra.mxu1 %vm625_vm8, %v613_v57 }
 0x2a6   : > { %v618_v59 = vshrl.u32 %v617_v58, 16 }
 0x2a8   : > { %773 = vmatmul.msk.bf16.vlgmr.msra.gmra.mxu0 %vm625_vm8, %v618_v59 }
 0x322   : > { %v665_v60 = vpop.f32.mrf.mxu1 }
 0x325   : > { %v641_v61 = vpop.f32.mrf.mxu0 }
 0x326   : > { %v666_v63 = vadd.f32 %v665_v60, %v641_v61 }
 0x328   : > { %v671_v0 = vadd.f32 %v670_v62, %v666_v63 }
 0x32a   : > { %829 = vtanh.f32 %v671_v0  ;;  %v667_v1 = vpop.f32.mrf.mxu1 }
 0x32d   : > { %v643_v2 = vpop.f32.mrf.mxu0 }
 0x330   : > { %v830_v3 = vpop.eup %829 }
 0x331   : > { %674 = vst.msk [vmem:[%s1018_s9] sm:$0x1] %vm673_vm9, %v830_v3 }
 0x332 PF: > { %s21_s13 = sadd.s32 1, %s853_s13   ;;  %s1019_s11 = smov %s849_s12 }
 0x333   : > { %p18_p7 = scmp.ge.s32.totalorder %s21_s13, 4   ;;  %s1020_s12 = smov %s1022_s7 }
 0x335   :  { %20 = sbr.rel (!%p18_p7) target bundleno = 2 (0x2), region = 108 }

// kernel: net_forward.3
= control target key start
LH: loop header
LB: loop body
LE: loop exit
PB: predicated region body
PF: predicated region fallthrough
CT: control target
= control target key end

     0   :  { %s818_s11 = smov 0   ;;  %s820_s12 = smov 0   ;;  %s905_s0 = inlined_call_operand.vmem [shape: bf16[8,8], index: 0, kind: input, shape index: {}]   ;;  %s906_s1 = inlined_call_operand.vmem [shape: bf16[8,17], index: 1, kind: input, shape index: {}]   ;;  %s907_s2 = inlined_call_operand.vmem [shape: bf16[16,32], index: 2, kind: input, shape index: {}]   ;;  %s908_s3 = inlined_call_operand.vmem [shape: bf16[17,32], index: 3, kind: input, shape index: {}]   ;;  %s909_s4 = inlined_call_operand.vmem [shape: f32[1,32], index: 4, kind: input, shape index: {}]   ;;  %s910_s5 = inlined_call_operand.vmem [shape: f32[1,32], index: 5, kind: input, shape index: {}]   ;;  %s911_s6 = inlined_call_operand.vmem [shape: bf16[2,32], index: 6, kind: input, shape index: {}]   ;;  %s912_s7 = inlined_call_operand.<no memory space> [shape: f32[1,1], index: 7, kind: input, shape index: {}]   ;;  %s913_s8 = inlined_call_operand.vmem [shape: bf16[8,32], index: 8, kind: output, shape index: {0}]   ;;  %s914_s9 = inlined_call_operand.vmem [shape: f32[1,8], index: 9, kind: output, shape index: {1}]  }
   0x1   :  { %15 = sst [smem:[#allocation5]] %s912_s7  ;;  %s822_s13 = smov 0  }
   0x2 LB: > { %s33_s7 = sadd.s32 1, %s756_s12  ;;  %p679_p0 = scmp.ge.s32.totalorder %s760_s13, 1  ;;  %s760_s13 = sphi %s822_s13, %s21_s13   ;;  %s756_s12 = sphi %s820_s12, %s916_s12   ;;  %s752_s11 = sphi %s818_s11, %s915_s11  }
   0x3   : > { %p35_p1 = scmp.ge.s32.totalorder %s33_s7, 2  ;;  %p290_p2 = scmp.lt.s32.totalorder %s760_s13, 3 }
   0x5   : > { %s918_s7 = smov (%p35_p1, %s33_s7), 0  ;;  %p291_p3 = pnand %p679_p0, %p290_p2 }
   0x6   : > { %p327_p4 = scmp.eq.s32.totalorder (!%p291_p3), %s752_s11, 0 }
   0x7   : > { %294 = sbr.rel (%p291_p3) target bundleno = 800 (0x320), region = 52 }
   0xc   : > { %332 = sbr.rel (!%p327_p4) target bundleno = 17 (0x11), region = 56  ;;  %vm333_vm0 = vcmask (%p327_p4), 253952   ;;  %v762_v0 = vmov (%p327_p4), 0.0  }
   0xd   : > { %334 = vst.msk [vmem:[#allocation2] sm:$0x1] (%p327_p4), %vm333_vm0, %v762_v0 }
   0xe   : > { %335 = vst.msk [vmem:[#allocation3] sm:$0x1] (%p327_p4), %vm333_vm0, %v762_v0 }
  0x11 PF: > { %p681_p5 = scmp.ne.s32.totalorder %s752_s11, 0 }
  0x13   : > { %338 = sbr.rel (%p681_p5) target bundleno = 445 (0x1bd), region = 60 }
  0x18   : > { %v344_v1 = vld [vmem:[%s906_s1] sm:$0xf]  ;;  %vm349_vm1 = vcmask 1043456   ;;  %vm345_vm2 = vcmask 64512   ;;  %v763_v4 = vmov 16   ;;  %vm410_vm3 = vcmask 1040384  }
  0x19   : > { %v351_v2 = vsel %vm349_vm1, %v344_v1, 0  ;;  %v343_v3 = vld [vmem:[%s905_s0] sm:$0xf]  ;;  %731 = vset.pattern.permute.xlu0 %v763_v4  ;;  %v396_v5 = vld [vmem:[%s908_s3 + $0x8] sm:$0x1]  ;;  %v764_v7 = vmov 0  }
  0x1a   : > { %360 = vmatpush.bf16.msra.mxu0 %v351_v2  ;;  %v402_v6 = vunpack.c.l.b16 %v396_v5  ;;  %v412_v8 = vsel %vm410_vm3, 65535, %v764_v7  ;;  %v703_v11 = vld [vmem:[%s908_s3] sm:$0xff]  ;;  %vm406_vm8 = vcmask 138240   ;;  %vm435_vm9 = vcmask 130048   ;;  %v457_v48 = vld [vmem:[#allocation2] sm:$0x1] }
  0x1b   : > { %v702_v25 = vld [vmem:[%s907_s2] sm:$0xff]  ;;  %vm458_vm10 = vcmask 261120   ;;  %vm455_vm11 = vcmask 257024   ;;  %vm467_vm12 = vcmask 253952   ;;  %v469_v51 = vld [vmem:[#allocation3] sm:$0x1] }
  0x1c   : > { %v404_v9 = vpack.c.b16 %v402_v6, %v402_v6  ;;  %446 = vmatpush.bf16.msra.mxu2 %v702_v25  ;;  %v391_v26 = vld [vmem:[%s906_s1] sm:$0xf] }
  0x1d   : > { %682 = vmatmul.msk.bf16.vlgmr.msra.gmra.mxu0 %vm345_vm2, %v343_v3 }
  0x1e   : > { %v414_v10 = vand.u32 %v412_v8, %v404_v9 }
  0x20   : > { %422 = vmatpush.bf16.msra.mxu1 %v414_v10 }
  0x24   : > { %423 = vmatpush.bf16.msra.mxu1 %v703_v11 }
  0x27   : > { %687 = vmatmul.msk.bf16.vlgmr.msra.gmra.mxu1 %vm406_vm8, %v391_v26 }
  0x9a   : > { %v362_v12 = vpop.f32.mrf.mxu0 }
  0x9b   : > { %v366_v13 = vmax.f32 %v362_v12, 1.0 }
  0x9d   : > { %732 = vrcp.f32 %v366_v13  ;;  %v378_v18 = vand.u32 2147483648, %v366_v13  ;;  %v376_v20 = vand.u32 2147483647, %v366_v13  ;;  %vm372_vm5 = vweird.f32 %v366_v13 }
  0x9f   : > { %v379_v22 = vor.u32 1.1754944e-38, %v378_v18  ;;  %vm377_vm7 = vcmp.eq.f32.partialorder %v376_v20, 8.507059e+37 }
  0xa2   : > { %v364_v14 = vpop.f32.mrf.mxu0 }
  0xa3   : > { %v733_v15 = vpop.eup %732 }
  0xa4   : > { %v368_v16 = vmul.f32 %v733_v15, %v366_v13  ;;  %vm373_vm4 = vweird.f32 %v733_v15  ;;  %v425_v30 = vpop.f32.mrf.mxu1 }
  0xa5   : > { %vm374_vm6 = vmor %vm372_vm5, %vm373_vm4 }
  0xa6   : > { %v369_v17 = vsub.f32 1.0, %v368_v16 }
  0xa8   : > { %v370_v19 = vmul.f32 %v733_v15, %v369_v17 }
  0xaa   : > { %v371_v21 = vadd.f32 %v733_v15, %v370_v19 }
  0xac   : > { %v375_v23 = vsel %vm374_vm6, %v733_v15, %v371_v21  ;;  %v427_v31 = vpop.f32.mrf.mxu1 }
  0xad   : > { %v380_v24 = vsel %vm377_vm7, %v379_v22, %v375_v23 }
  0xae   : > { %384 = vperm.xlu0 %731, %v380_v24  }
 0x120   : > { %v385_v27 = vpop.permute.xlu0 %384 }
 0x121   : > { %v387_v28 = vmul.f32 %v385_v27, %v362_v12 }
 0x123   : > { %v388_v29 = vpack.c.bf16 %v387_v28, %v387_v28 }
 0x125   : > { %692 = vmatmul.msk.bf16.vlgmr.msra.gmra.mxu2 %vm435_vm9, %v388_v29 }
 0x1a8   : > { %v448_v32 = vpop.f32.mrf.mxu2 }
 0x1a9   : > { %v449_v33 = vadd.f32 %v448_v32, %v425_v30 }
 0x1ab   : > { %v452_v34 = vpack.c.bf16 %v449_v33, %v449_v33  ;;  %v459_v35 = vsel %vm458_vm10, %v449_v33, 0.0  ;;  %v470_v36 = vmul.f32 %v449_v33, %v449_v33 }
 0x1ac   : > { %v460_v37 = vrot.slane %v459_v35, 4 }
 0x1ad   : > { %456 = vst.msk [vmem:[%s913_s8] sm:$0xf] %vm455_vm11, %v452_v34  ;;  %v471_v38 = vsel %vm458_vm10, %v470_v36, 0.0 }
 0x1ae   : > { %v461_v39 = vadd.f32 %v460_v37, %v459_v35  ;;  %v472_v40 = vrot.slane %v471_v38, 4 }
 0x1b0   : > { %v462_v41 = vrot.slane %v461_v39, 2  ;;  %v473_v42 = vadd.f32 %v472_v40, %v471_v38  ;;  %v450_v43 = vpop.f32.mrf.mxu2 }
 0x1b2   : > { %v463_v44 = vadd.f32 %v462_v41, %v461_v39  ;;  %v474_v45 = vrot.slane %v473_v42, 2 }
 0x1b4   : > { %v464_v46 = vrot.slane %v463_v44, 1  ;;  %v475_v47 = vadd.f32 %v474_v45, %v473_v42 }
 0x1b6   : > { %v465_v49 = vadd.f32 %v464_v46, %v463_v44  ;;  %v476_v50 = vrot.slane %v475_v47, 1 }
 0x1b8   : > { %v466_v52 = vadd.f32 %v465_v49, %v457_v48  ;;  %v477_v53 = vadd.f32 %v476_v50, %v475_v47 }
 0x1ba   : > { %468 = vst.msk [vmem:[#allocation2] sm:$0x1] %vm467_vm12, %v466_v52  ;;  %v478_v54 = vadd.f32 %v477_v53, %v469_v51 }
 0x1bc   : > { %479 = vst.msk [vmem:[#allocation3] sm:$0x1] %vm467_vm12, %v478_v54 }
 0x1bd PF: > { %481 = sbr.rel (!%p327_p4) target bundleno = 642 (0x282), region = 64  ;;  %v500_v5 = vld [vmem:[%s909_s4] sm:$0x1] (%p327_p4)  ;;  %vm517_vm0 = vcmask (%p327_p4), 257024   ;;  %vm521_vm1 = vcmask (%p327_p4), 261120   ;;  %vm542_vm2 = vcmask (%p327_p4), 57344  }
 0x1be   : > { %v505_v6 = vld [vmem:[%s913_s8] sm:$0xf] (%p327_p4)  ;;  %vm543_vm3 = vsmask.f32 (%p327_p4), 256  ;;  %v545_v23 = vld [vmem:[#allocation4] sm:$0x1] (%p327_p4) }
 0x1bf   : > { %v506_v9 = vunpack.c.l.bf16 (%p327_p4), %v505_v6  ;;  %v502_v10 = vld [vmem:[%s910_s5] sm:$0x1] (%p327_p4)  ;;  %vm544_vm4 = vmand (%p327_p4), %vm542_vm2, %vm543_vm3 }
 0x1c0   : > { %v519_v21 = vld [vmem:[%s911_s6] sm:$0x1] (%p327_p4) }
 0x1c1   : > { %v482_v55 = vld [vmem:[#allocation2] sm:$0x1] (%p327_p4) }
 0x1c2   : > { %v483_v57 = vmul.f32 0.125, %v482_v55 }
 0x1c3   : > { %v484_v56 = vld [vmem:[#allocation3] sm:$0x1] }
 0x1c4   : > { %v485_v58 = vmul.f32 0.125, %v484_v56  ;;  %v486_v59 = vmul.f32 %v483_v57, %v483_v57 }
 0x1c6   : > { %v487_v60 = vsub.f32 %v485_v58, %v486_v59 }
 0x1c8   : > { %v488_v61 = vmax.f32 %v487_v60, 0.0 }
 0x1ca   : > { %v489_v62 = vadd.f32 1e-05, %v488_v61 }
 0x1cc   : > { %734 = vrsqrt.f32 %v489_v62  ;;  %vm496_vm13 = vweird.f32 %v489_v62 }
 0x1d2   : > { %v735_v63 = vpop.eup %734 }
 0x1d3   : > { %v491_v0 = vmul.f32 %v735_v63, %v489_v62  ;;  %vm497_vm14 = vweird.f32 %v735_v63 }
 0x1d4   : > { %vm498_vm15 = vmor %vm496_vm13, %vm497_vm14 }
 0x1d5   : > { %v492_v1 = vmul.f32 %v735_v63, %v491_v0 }
 0x1d7   : > { %v493_v2 = vmul.f32 0.5, %v492_v1 }
 0x1d9   : > { %v494_v3 = vsub.f32 1.5, %v493_v2 }
 0x1db   : > { %v495_v4 = vmul.f32 %v735_v63, %v494_v3 }
 0x1dd   : > { %v499_v7 = vsel %vm498_vm15, %v735_v63, %v495_v4 }
 0x1de   : > { %v501_v8 = vmul.f32 %v500_v5, %v499_v7 }
 0x1e0   : > { %v503_v11 = vmul.f32 %v501_v8, %v483_v57  ;;  %v508_v12 = vperm.slane %v501_v8, 0 }
 0x1e2   : > { %v504_v13 = vsub.f32 %v502_v10, %v503_v11  ;;  %v510_v14 = vmul.f32 %v508_v12, %v506_v9 }
 0x1e4   : > { %v512_v15 = vperm.slane %v504_v13, 0 }
 0x1e6   : > { %v514_v16 = vadd.f32 %v512_v15, %v510_v14 }
 0x1e8   : > { %v515_v17 = vmax.f32 %v514_v16, 0.0 }
 0x1ea   : > { %v516_v18 = vpack.c.bf16 %v515_v17, %v515_v17 }
 0x1ec   : > { %518 = vst.msk [vmem:[%s913_s8] sm:$0xf] %vm517_vm0, %v516_v18 }
 0x1f3   : > { %v520_v19 = vld [vmem:[%s913_s8] sm:$0xf] }
 0x1f4   : > { %v526_v20 = vsel %vm521_vm1, %v520_v19, 0 }
 0x1f5   : > { %535 = vmatpush.bf16.xpose.msra.mxu0 %v526_v20 }
 0x1fc   : > { %693 = vmatmul.msk.bf16.vlgmr.msra.gmra.mxu0 %vm521_vm1, %v519_v21 }
 0x279   : > { %v537_v22 = vpop.f32.mrf.mxu0 }
 0x27a   : > { %v541_v24 = vpack.c.bf16 %v537_v22, %v537_v22 }
 0x27c   : > { %v546_v25 = vsel %vm544_vm4, %v541_v24, %v545_v23 }
 0x27d   : > { %547 = vst [vmem:[#allocation4] sm:$0x1] %v546_v25 }
 0x281   : > { %v539_v26 = vpop.f32.mrf.mxu0 }
 0x282 PF: > { %p694_p6 = scmp.ne.s32.totalorder %s752_s11, 1 }
 0x283   : > { %s607_s11 = sld [smem:[#allocation5]] (!%p694_p6) }
 0x284   : > { %551 = sbr.rel (%p694_p6) target bundleno = 800 (0x320), region = 68 }
 0x289   : > { %v556_v27 = vld [vmem:[%s905_s0] sm:$0xf]  ;;  %vm587_vm5 = vcmask 64512   ;;  %vm567_vm6 = vcmask 261120   ;;  %v560_v32 = vld [vmem:[#allocation4] sm:$0x1]  ;;  %v608_v37 = vstv %s607_s11 }
 0x28a   : > { %v559_v28 = vld [vmem:[%s913_s8] sm:$0xf]  ;;  %v592_v29 = vsel %vm587_vm5, %v556_v27, 0  ;;  %vm611_vm7 = vcmask 57344  }
 0x28b   : > { %v572_v30 = vsel %vm567_vm6, %v559_v28, 0  ;;  %v561_v31 = vld [vmem:[%s911_s6] sm:$0x1]  ;;  %601 = vmatpush.bf16.xpose.msra.mxu1 %v592_v29 }
 0x28c   : > { %581 = vmatpush.bf16.xpose.msra.mxu0 %v572_v30  ;;  %563 = vst [vmem:[#allocation1] ss:$9 sm:$0xff] %v561_v31 }
 0x292   : > { %696 = vmatmul.msk.bf16.vlgmr.msra.gmra.mxu1 %vm587_vm5, %v560_v32 }
 0x293   : > { %v564_v33 = vld [vmem:[#allocation1] sm:$0xff] }
 0x294   : > { %v565_v34 = vshrl.u32 %v564_v33, 16 }
 0x296   : > { %695 = vmatmul.msk.bf16.vlgmr.msra.gmra.mxu0 %vm567_vm6, %v565_v34 }
 0x30f   : > { %v603_v35 = vpop.f32.mrf.mxu1 }
 0x313   : > { %v583_v36 = vpop.f32.mrf.mxu0 }
 0x314   : > { %v604_v38 = vadd.f32 %v603_v35, %v583_v36 }
 0x316   : > { %v609_v39 = vadd.f32 %v608_v37, %v604_v38 }
 0x317   : > { %v605_v40 = vpop.f32.mrf.mxu1 }
 0x318   : > { %736 = vtanh.f32 %v609_v39 }
 0x31b   : > { %v585_v41 = vpop.f32.mrf.mxu0 }
 0x31e   : > { %v737_v42 = vpop.eup %736 }
 0x31f   : > { %612 = vst.msk [vmem:[%s914_s9] sm:$0x1] %vm611_vm7, %v737_v42 }
 0x320 PF: > { %s21_s13 = sadd.s32 1, %s760_s13   ;;  %s915_s11 = smov %s756_s12 }
 0x321   : > { %p18_p7 = scmp.ge.s32.totalorder %s21_s13, 4   ;;  %s916_s12 = smov %s918_s7 }
 0x323   :  { %20 = sbr.rel (!%p18_p7) target bundleno = 2 (0x2), region = 108 }

</bundles_post_ra>
